<compile_context>
chip_gen: v6e
topology: v6e:2x2x1
jax: 0.10.0
libtpu: 0.0.40
codegen_flags: <defaults>
</compile_context>

<pallas_src>
import jax
import jax.numpy as jnp
from jax.experimental import pallas as pl
from jax.experimental.pallas import tpu as pltpu


# ---------------- config (mirrors config.parameters.dreamer.encoder, small) ---
DEPTH = 8                 # dreamer default is 32; kept small for the demo
KERNEL_SIZE = 4
STRIDE = 2
OBS_SHAPE = (3, 64, 64)   # (C, H, W) channels-first, as in the PyTorch module
# activation = ReLU (SimpleDreamer encoder config default)

TILE_M = 512              # target rows per grid step (tile-size sweep sweet spot)


def _round_up(x, m):
    return (x + m - 1) // m * m


# ------------------------------- Pallas kernel --------------------------------
def conv_mm_kernel(x_ref, w_ref, b_ref, o_ref):
    # (tm, K) bf16 @ (K, Cout) bf16 -> f32 accumulation on the MXU
    acc = jnp.dot(x_ref[...], w_ref[...], preferred_element_type=jnp.float32)
    acc = acc + b_ref[...]                                    # (1, Cout) broadcast
    o_ref[...] = jnp.maximum(acc, 0.0).astype(o_ref.dtype)    # fused ReLU + cast


# ------------------------------- conv layer wrapper ----------------------------
def _im2col_nhwc(x, k, s):
    """(N, H, W, C) -> (N, OH, OW, k*k*C). Strided slices only, no compute."""
    n, h, w, c = x.shape
    oh = (h - k) // s + 1
    ow = (w - k) // s + 1
    taps = []
    for kh in range(k):
        for kw in range(k):
            taps.append(jax.lax.slice(
                x,
                (0, kh, kw, 0),
                (n, kh + s * (oh - 1) + 1, kw + s * (ow - 1) + 1, c),
                strides=(1, s, s, 1)))
    return jnp.concatenate(taps, axis=-1), oh, ow


def conv2d_relu_pallas(x_nhwc, w_hwio, b, *, stride=STRIDE, tile_m=TILE_M,
                       out_dtype=jnp.bfloat16):
    n, _, _, cin = x_nhwc.shape
    k = w_hwio.shape[0]
    cout = w_hwio.shape[-1]

    # bf16 before the concat -> half the im2col intermediate / patch DMA bytes
    patches, oh, ow = _im2col_nhwc(x_nhwc.astype(jnp.bfloat16), k, stride)
    kk = k * k * cin
    m = n * oh * ow

    x2d = patches.reshape(m, kk)
    w2d = w_hwio.reshape(kk, cout).astype(jnp.bfloat16)
    b2d = b.reshape(1, cout).astype(jnp.float32)

    # Adaptive row tile: smallest tm (multiple of 16 for bf16 sublane packing)
    # that covers m in ceil(m / tile_m) blocks -> minimal zero-padding.
    nblk = max(1, -(-m // tile_m))
    tm = _round_up(-(-m // nblk), 16)
    m_pad = nblk * tm
    if m_pad != m:
        x2d = jnp.pad(x2d, ((0, m_pad - m), (0, 0)))

    out = pl.pallas_call(
        conv_mm_kernel,
        out_shape=jax.ShapeDtypeStruct((m_pad, cout), out_dtype),
        grid=(nblk,),
        in_specs=[
            pl.BlockSpec((tm, kk), lambda i: (i, 0)),      # row-tiled patches
            pl.BlockSpec((kk, cout), lambda i: (0, 0)),    # weights: VMEM-resident
            pl.BlockSpec((1, cout), lambda i: (0, 0)),     # bias:    VMEM-resident
        ],
        out_specs=pl.BlockSpec((tm, cout), lambda i: (i, 0)),
        compiler_params=pltpu.CompilerParams(
            dimension_semantics=("parallel",)),            # megacore on v7x
    )(x2d, w2d, b2d)

    return out[:m].reshape(n, oh, ow, cout)


# ------------------------------- Encoder forward -------------------------------
def _leading_shape(x):
    bwh = x.shape[:-len(OBS_SHAPE)]
    return bwh if bwh else (1,)


def encoder_forward(params, x):
    """horizontal_forward(network, x, input_shape=OBS_SHAPE) equivalent."""
    bwh = _leading_shape(x)
    h = x.reshape(-1, *OBS_SHAPE)                 # (N, C, H, W)
    h = jnp.transpose(h, (0, 2, 3, 1))            # NHWC for TPU-friendly layout
    n_layers = len(params)
    for li, (w, b) in enumerate(params):
        last = li == n_layers - 1
        h = conv2d_relu_pallas(
            h, w, b, out_dtype=jnp.float32 if last else jnp.bfloat16)
    h = jnp.transpose(h, (0, 3, 1, 2))            # back to NCHW flatten order
    return h.reshape(*bwh, -1)


# ------------------------------- pure-JAX reference ----------------------------
def reference_forward(params, x):
    bwh = _leading_shape(x)
    h = jnp.transpose(x.reshape(-1, *OBS_SHAPE), (0, 2, 3, 1)).astype(jnp.float32)
    for (w, b) in params:
        y = jax.lax.conv_general_dilated(
            h.astype(jnp.bfloat16), w.astype(jnp.bfloat16),
            window_strides=(STRIDE, STRIDE), padding="VALID",
            dimension_numbers=("NHWC", "HWIO", "NHWC"),
            preferred_element_type=jnp.float32)
        h = jnp.maximum(y + b.reshape(1, 1, 1, -1), 0.0)
    h = jnp.transpose(h, (0, 3, 1, 2))
    return h.reshape(*bwh, -1)


# --------------------------- deterministic parameters --------------------------
def init_params(key):
    """Kaiming-uniform (relu gain) conv weights in HWIO layout, zero biases."""
    chans = [OBS_SHAPE[0], DEPTH * 1, DEPTH * 2, DEPTH * 4, DEPTH * 8]
    params = []
    keys = jax.random.split(key, len(chans) - 1)
    for i in range(len(chans) - 1):
        cin, cout = chans[i], chans[i + 1]
        fan_in = cin * KERNEL_SIZE * KERNEL_SIZE
        bound = jnp.sqrt(6.0 / fan_in)
        w = jax.random.uniform(keys[i], (KERNEL_SIZE, KERNEL_SIZE, cin, cout),
                               jnp.float32, -bound, bound)
        b = jnp.zeros((cout,), jnp.float32)
        params.append((w, b))
    return tuple(params)


# ------------------------------------ main -------------------------------------
if __name__ == "__main__":
    key = jax.random.PRNGKey(0)
    kp, kx = jax.random.split(key)

    params = init_params(kp)

    batch, horizon = 2, 3
    x = jax.random.normal(kx, (batch, horizon, *OBS_SHAPE), jnp.float32)

    out = jax.jit(encoder_forward)(params, x)
    jax.block_until_ready(out)

    # expected flattened feature size: C4 * H4 * W4
    hs = OBS_SHAPE[1]
    for _ in range(4):
        hs = (hs - KERNEL_SIZE) // STRIDE + 1
    embed = DEPTH * 8 * hs * hs
    assert out.shape == (batch, horizon, embed), out.shape

    ref = reference_forward(params, x)
    max_err = float(jnp.max(jnp.abs(out - ref)))
    assert jnp.allclose(out, ref, atol=2e-3, rtol=2e-3), f"max_err={max_err}"

    print("KERNEL_OK")
</pallas_src>

<mosaic_0001>
module attributes {stable_mosaic.version = 11 : i64} {
  func.func @conv_mm_kernel(%arg0: i32, %arg1: memref<496x48xbf16, #tpu.memory_space<vmem>>, %arg2: memref<48x8xbf16, #tpu.memory_space<vmem>>, %arg3: memref<1x8xf32, #tpu.memory_space<vmem>>, %arg4: memref<496x8xbf16, #tpu.memory_space<vmem>>) attributes {dimension_semantics = [#tpu.dimension_semantics<parallel>], iteration_bounds = array<i64: 12>, scalar_prefetch = 0 : i64, scratch_operands = 0 : i64, tpu.core_type = #tpu.core_type<tc>, window_params = [{transform_indices = @transform_0, window_bounds = array<i64: 496, 48>}, {pipeline_mode = #tpu.pipeline_mode<synchronous>, transform_indices = @transform_1, window_bounds = array<i64: 48, 8>}, {pipeline_mode = #tpu.pipeline_mode<synchronous>, transform_indices = @transform_2, window_bounds = array<i64: 1, 8>}, {transform_indices = @transform_3, window_bounds = array<i64: 496, 8>}]} {
    %c0 = arith.constant 0 : index
    %c0_0 = arith.constant 0 : index
    %0 = vector.load %arg1[%c0, %c0_0] : memref<496x48xbf16, #tpu.memory_space<vmem>>, vector<496x48xbf16>
    %c0_1 = arith.constant 0 : index
    %c0_2 = arith.constant 0 : index
    %1 = vector.load %arg2[%c0_1, %c0_2] : memref<48x8xbf16, #tpu.memory_space<vmem>>, vector<48x8xbf16>
    %cst = arith.constant dense<0.000000e+00> : vector<496x8xf32>
    %2 = tpu.matmul %0, %1, %cst {dimension_numbers = #tpu.dot_dimension_numbers<[1], [0], [0], [1], [0, 0, 1, 1], [], []>} : vector<496x48xbf16>, vector<48x8xbf16>, vector<496x8xf32> -> vector<496x8xf32>
    %c0_3 = arith.constant 0 : index
    %c0_4 = arith.constant 0 : index
    %3 = vector.load %arg3[%c0_3, %c0_4] : memref<1x8xf32, #tpu.memory_space<vmem>>, vector<1x8xf32>
    %4 = vector.broadcast %3 : vector<1x8xf32> to vector<496x8xf32>
    %5 = arith.addf %2, %4 : vector<496x8xf32>
    %cst_5 = arith.constant 0.000000e+00 : f32
    %6 = vector.broadcast %cst_5 : f32 to vector<496x8xf32>
    %7 = arith.maximumf %5, %6 : vector<496x8xf32>
    %8 = arith.truncf %7 : vector<496x8xf32> to vector<496x8xbf16>
    %c0_6 = arith.constant 0 : index
    %c0_7 = arith.constant 0 : index
    %9 = vector.load %arg4[%c0_6, %c0_7] : memref<496x8xbf16, #tpu.memory_space<vmem>>, vector<496x8xbf16>
    tpu.vector_store %arg4[%c0_6, %c0_7], %8 {strides = array<i32>} : memref<496x8xbf16, #tpu.memory_space<vmem>>, vector<496x8xbf16>,
    return
  }
  func.func @transform_0(%arg0: i32) -> (i32, i32) {
    %c0_i32 = arith.constant 0 : i32
    %c0_i32_0 = arith.constant 0 : i32
    return %arg0, %c0_i32 : i32, i32
  }
  func.func @transform_1(%arg0: i32) -> (i32, i32) {
    %c0_i32 = arith.constant 0 : i32
    %c0_i32_0 = arith.constant 0 : i32
    %c0_i32_1 = arith.constant 0 : i32
    return %c0_i32, %c0_i32_0 : i32, i32
  }
  func.func @transform_2(%arg0: i32) -> (i32, i32) {
    %c0_i32 = arith.constant 0 : i32
    %c0_i32_0 = arith.constant 0 : i32
    %c0_i32_1 = arith.constant 0 : i32
    return %c0_i32, %c0_i32_0 : i32, i32
  }
  func.func @transform_3(%arg0: i32) -> (i32, i32) {
    %c0_i32 = arith.constant 0 : i32
    %c0_i32_0 = arith.constant 0 : i32
    return %arg0, %c0_i32 : i32, i32
  }
}

module attributes {stable_mosaic.version = 11 : i64} {
  func.func @conv_mm_kernel(%arg0: i32, %arg1: memref<400x128xbf16, #tpu.memory_space<vmem>>, %arg2: memref<128x16xbf16, #tpu.memory_space<vmem>>, %arg3: memref<1x16xf32, #tpu.memory_space<vmem>>, %arg4: memref<400x16xbf16, #tpu.memory_space<vmem>>) attributes {dimension_semantics = [#tpu.dimension_semantics<parallel>], iteration_bounds = array<i64: 3>, scalar_prefetch = 0 : i64, scratch_operands = 0 : i64, tpu.core_type = #tpu.core_type<tc>, window_params = [{transform_indices = @transform_0, window_bounds = array<i64: 400, 128>}, {pipeline_mode = #tpu.pipeline_mode<synchronous>, transform_indices = @transform_1, window_bounds = array<i64: 128, 16>}, {pipeline_mode = #tpu.pipeline_mode<synchronous>, transform_indices = @transform_2, window_bounds = array<i64: 1, 16>}, {transform_indices = @transform_3, window_bounds = array<i64: 400, 16>}]} {
    %c0 = arith.constant 0 : index
    %c0_0 = arith.constant 0 : index
    %0 = vector.load %arg1[%c0, %c0_0] : memref<400x128xbf16, #tpu.memory_space<vmem>>, vector<400x128xbf16>
    %c0_1 = arith.constant 0 : index
    %c0_2 = arith.constant 0 : index
    %1 = vector.load %arg2[%c0_1, %c0_2] : memref<128x16xbf16, #tpu.memory_space<vmem>>, vector<128x16xbf16>
    %cst = arith.constant dense<0.000000e+00> : vector<400x16xf32>
    %2 = tpu.matmul %0, %1, %cst {dimension_numbers = #tpu.dot_dimension_numbers<[1], [0], [0], [1], [0, 0, 1, 1], [], []>} : vector<400x128xbf16>, vector<128x16xbf16>, vector<400x16xf32> -> vector<400x16xf32>
    %c0_3 = arith.constant 0 : index
    %c0_4 = arith.constant 0 : index
    %3 = vector.load %arg3[%c0_3, %c0_4] : memref<1x16xf32, #tpu.memory_space<vmem>>, vector<1x16xf32>
    %4 = vector.broadcast %3 : vector<1x16xf32> to vector<400x16xf32>
    %5 = arith.addf %2, %4 : vector<400x16xf32>
    %cst_5 = arith.constant 0.000000e+00 : f32
    %6 = vector.broadcast %cst_5 : f32 to vector<400x16xf32>
    %7 = arith.maximumf %5, %6 : vector<400x16xf32>
    %8 = arith.truncf %7 : vector<400x16xf32> to vector<400x16xbf16>
    %c0_6 = arith.constant 0 : index
    %c0_7 = arith.constant 0 : index
    %9 = vector.load %arg4[%c0_6, %c0_7] : memref<400x16xbf16, #tpu.memory_space<vmem>>, vector<400x16xbf16>
    tpu.vector_store %arg4[%c0_6, %c0_7], %8 {strides = array<i32>} : memref<400x16xbf16, #tpu.memory_space<vmem>>, vector<400x16xbf16>,
    return
  }
  func.func @transform_0(%arg0: i32) -> (i32, i32) {
    %c0_i32 = arith.constant 0 : i32
    %c0_i32_0 = arith.constant 0 : i32
    return %arg0, %c0_i32 : i32, i32
  }
  func.func @transform_1(%arg0: i32) -> (i32, i32) {
    %c0_i32 = arith.constant 0 : i32
    %c0_i32_0 = arith.constant 0 : i32
    %c0_i32_1 = arith.constant 0 : i32
    return %c0_i32, %c0_i32_0 : i32, i32
  }
  func.func @transform_2(%arg0: i32) -> (i32, i32) {
    %c0_i32 = arith.constant 0 : i32
    %c0_i32_0 = arith.constant 0 : i32
    %c0_i32_1 = arith.constant 0 : i32
    return %c0_i32, %c0_i32_0 : i32, i32
  }
  func.func @transform_3(%arg0: i32) -> (i32, i32) {
    %c0_i32 = arith.constant 0 : i32
    %c0_i32_0 = arith.constant 0 : i32
    return %arg0, %c0_i32 : i32, i32
  }
}

module attributes {stable_mosaic.version = 11 : i64} {
  func.func @conv_mm_kernel(%arg0: i32, %arg1: memref<224x256xbf16, #tpu.memory_space<vmem>>, %arg2: memref<256x32xbf16, #tpu.memory_space<vmem>>, %arg3: memref<1x32xf32, #tpu.memory_space<vmem>>, %arg4: memref<224x32xbf16, #tpu.memory_space<vmem>>) attributes {dimension_semantics = [#tpu.dimension_semantics<parallel>], iteration_bounds = array<i64: 1>, scalar_prefetch = 0 : i64, scratch_operands = 0 : i64, tpu.core_type = #tpu.core_type<tc>, window_params = [{transform_indices = @transform_0, window_bounds = array<i64: 224, 256>}, {pipeline_mode = #tpu.pipeline_mode<synchronous>, transform_indices = @transform_1, window_bounds = array<i64: 256, 32>}, {pipeline_mode = #tpu.pipeline_mode<synchronous>, transform_indices = @transform_2, window_bounds = array<i64: 1, 32>}, {transform_indices = @transform_3, window_bounds = array<i64: 224, 32>}]} {
    %c0 = arith.constant 0 : index
    %c0_0 = arith.constant 0 : index
    %0 = vector.load %arg1[%c0, %c0_0] : memref<224x256xbf16, #tpu.memory_space<vmem>>, vector<224x256xbf16>
    %c0_1 = arith.constant 0 : index
    %c0_2 = arith.constant 0 : index
    %1 = vector.load %arg2[%c0_1, %c0_2] : memref<256x32xbf16, #tpu.memory_space<vmem>>, vector<256x32xbf16>
    %cst = arith.constant dense<0.000000e+00> : vector<224x32xf32>
    %2 = tpu.matmul %0, %1, %cst {dimension_numbers = #tpu.dot_dimension_numbers<[1], [0], [0], [1], [0, 0, 1, 1], [], []>} : vector<224x256xbf16>, vector<256x32xbf16>, vector<224x32xf32> -> vector<224x32xf32>
    %c0_3 = arith.constant 0 : index
    %c0_4 = arith.constant 0 : index
    %3 = vector.load %arg3[%c0_3, %c0_4] : memref<1x32xf32, #tpu.memory_space<vmem>>, vector<1x32xf32>
    %4 = vector.broadcast %3 : vector<1x32xf32> to vector<224x32xf32>
    %5 = arith.addf %2, %4 : vector<224x32xf32>
    %cst_5 = arith.constant 0.000000e+00 : f32
    %6 = vector.broadcast %cst_5 : f32 to vector<224x32xf32>
    %7 = arith.maximumf %5, %6 : vector<224x32xf32>
    %8 = arith.truncf %7 : vector<224x32xf32> to vector<224x32xbf16>
    %c0_6 = arith.constant 0 : index
    %c0_7 = arith.constant 0 : index
    %9 = vector.load %arg4[%c0_6, %c0_7] : memref<224x32xbf16, #tpu.memory_space<vmem>>, vector<224x32xbf16>
    tpu.vector_store %arg4[%c0_6, %c0_7], %8 {strides = array<i32>} : memref<224x32xbf16, #tpu.memory_space<vmem>>, vector<224x32xbf16>,
    return
  }
  func.func @transform_0(%arg0: i32) -> (i32, i32) {
    %c0_i32 = arith.constant 0 : i32
    %c0_i32_0 = arith.constant 0 : i32
    return %arg0, %c0_i32 : i32, i32
  }
  func.func @transform_1(%arg0: i32) -> (i32, i32) {
    %c0_i32 = arith.constant 0 : i32
    %c0_i32_0 = arith.constant 0 : i32
    %c0_i32_1 = arith.constant 0 : i32
    return %c0_i32, %c0_i32_0 : i32, i32
  }
  func.func @transform_2(%arg0: i32) -> (i32, i32) {
    %c0_i32 = arith.constant 0 : i32
    %c0_i32_0 = arith.constant 0 : i32
    %c0_i32_1 = arith.constant 0 : i32
    return %c0_i32, %c0_i32_0 : i32, i32
  }
  func.func @transform_3(%arg0: i32) -> (i32, i32) {
    %c0_i32 = arith.constant 0 : i32
    %c0_i32_0 = arith.constant 0 : i32
    return %arg0, %c0_i32 : i32, i32
  }
}

module attributes {stable_mosaic.version = 11 : i64} {
  func.func @conv_mm_kernel(%arg0: i32, %arg1: memref<32x512xbf16, #tpu.memory_space<vmem>>, %arg2: memref<512x64xbf16, #tpu.memory_space<vmem>>, %arg3: memref<1x64xf32, #tpu.memory_space<vmem>>, %arg4: memref<32x64xf32, #tpu.memory_space<vmem>>) attributes {dimension_semantics = [#tpu.dimension_semantics<parallel>], iteration_bounds = array<i64: 1>, scalar_prefetch = 0 : i64, scratch_operands = 0 : i64, tpu.core_type = #tpu.core_type<tc>, window_params = [{transform_indices = @transform_0, window_bounds = array<i64: 32, 512>}, {pipeline_mode = #tpu.pipeline_mode<synchronous>, transform_indices = @transform_1, window_bounds = array<i64: 512, 64>}, {pipeline_mode = #tpu.pipeline_mode<synchronous>, transform_indices = @transform_2, window_bounds = array<i64: 1, 64>}, {transform_indices = @transform_3, window_bounds = array<i64: 32, 64>}]} {
    %c0 = arith.constant 0 : index
    %c0_0 = arith.constant 0 : index
    %0 = vector.load %arg1[%c0, %c0_0] : memref<32x512xbf16, #tpu.memory_space<vmem>>, vector<32x512xbf16>
    %c0_1 = arith.constant 0 : index
    %c0_2 = arith.constant 0 : index
    %1 = vector.load %arg2[%c0_1, %c0_2] : memref<512x64xbf16, #tpu.memory_space<vmem>>, vector<512x64xbf16>
    %cst = arith.constant dense<0.000000e+00> : vector<32x64xf32>
    %2 = tpu.matmul %0, %1, %cst {dimension_numbers = #tpu.dot_dimension_numbers<[1], [0], [0], [1], [0, 0, 1, 1], [], []>} : vector<32x512xbf16>, vector<512x64xbf16>, vector<32x64xf32> -> vector<32x64xf32>
    %c0_3 = arith.constant 0 : index
    %c0_4 = arith.constant 0 : index
    %3 = vector.load %arg3[%c0_3, %c0_4] : memref<1x64xf32, #tpu.memory_space<vmem>>, vector<1x64xf32>
    %4 = vector.broadcast %3 : vector<1x64xf32> to vector<32x64xf32>
    %5 = arith.addf %2, %4 : vector<32x64xf32>
    %cst_5 = arith.constant 0.000000e+00 : f32
    %6 = vector.broadcast %cst_5 : f32 to vector<32x64xf32>
    %7 = arith.maximumf %5, %6 : vector<32x64xf32>
    %c0_6 = arith.constant 0 : index
    %c0_7 = arith.constant 0 : index
    %8 = vector.load %arg4[%c0_6, %c0_7] : memref<32x64xf32, #tpu.memory_space<vmem>>, vector<32x64xf32>
    tpu.vector_store %arg4[%c0_6, %c0_7], %7 {strides = array<i32>} : memref<32x64xf32, #tpu.memory_space<vmem>>, vector<32x64xf32>,
    return
  }
  func.func @transform_0(%arg0: i32) -> (i32, i32) {
    %c0_i32 = arith.constant 0 : i32
    %c0_i32_0 = arith.constant 0 : i32
    return %arg0, %c0_i32 : i32, i32
  }
  func.func @transform_1(%arg0: i32) -> (i32, i32) {
    %c0_i32 = arith.constant 0 : i32
    %c0_i32_0 = arith.constant 0 : i32
    %c0_i32_1 = arith.constant 0 : i32
    return %c0_i32, %c0_i32_0 : i32, i32
  }
  func.func @transform_2(%arg0: i32) -> (i32, i32) {
    %c0_i32 = arith.constant 0 : i32
    %c0_i32_0 = arith.constant 0 : i32
    %c0_i32_1 = arith.constant 0 : i32
    return %c0_i32, %c0_i32_0 : i32, i32
  }
  func.func @transform_3(%arg0: i32) -> (i32, i32) {
    %c0_i32 = arith.constant 0 : i32
    %c0_i32_0 = arith.constant 0 : i32
    return %arg0, %c0_i32 : i32, i32
  }
}

</mosaic_0001>

<bundles_post_ra>
// kernel: encoder_forward.4
= control target key start
LH: loop header
LB: loop body
LE: loop exit
PB: predicated region body
PF: predicated region fallthrough
CT: control target
= control target key end

     0   :  { %s1670_s12 = smov 0   ;;  %s2028_s0 = inlined_call_operand.vmem [shape: bf16[5952,48], index: 0, kind: input, shape index: {}]   ;;  %s2029_s1 = inlined_call_operand.vmem [shape: bf16[48,8], index: 1, kind: input, shape index: {}]   ;;  %s2030_s2 = inlined_call_operand.vmem [shape: f32[1,8], index: 2, kind: input, shape index: {}]   ;;  %s2031_s3 = inlined_call_operand.vmem [shape: bf16[5952,8], index: 3, kind: output, shape index: {}]  }
   0x1 LB: > { %s1227_s13 = sadd.s32 4294967295, %s1646_s12   ;;  %p1231_p0 = scmp.ge.s32.totalorder %s1646_s12, 1  ;;  %s1646_s12 = sphi %s1670_s12, %s13_s12  }
   0x2   : > { %p138_p1 = scmp.lt.s32.totalorder %s1646_s12, 13 }
   0x4   : > { %p139_p2 = pnand %p1231_p0, %p138_p1 }
   0x5   : > { %s162_s18 = smul.u32 (!%p139_p2), 62, %s1227_s13 }
   0x6   : > { %142 = sbr.rel (%p139_p2) target bundleno = 348 (0x15c), region = 32 }
   0x7   : > { %p163_p3 = scmp.lt.s32.totalorder (!%p139_p2), %s162_s18, 743 }
   0xb   : > { %v1606_v0 = vld [vmem:[%s2029_s1 + $0x10] sm:$0xff]   ;;  %v1648_v1 = vmov 0.0   ;;  %v1607_v2 = vld [vmem:[%s2029_s1 + $0x8] sm:$0xff]   ;;  %vm1649_vm0 = vmmov 0   ;;  %v1608_v3 = vld [vmem:[%s2029_s1] sm:$0xff]   ;;  %s2033_s18 = smov (!%p163_p3, %s162_s18), 743 }
   0xc   : > { %1460 = vmatprep.subr.bf16.mxu0 %v1648_v1  ;;  %1590 = vmatprep.subr.bf16.mxu1 %v1648_v1  ;;  %s1232_s21 = sshll.u32 %s2033_s18, 2  ;;  %vm423_vm1 = vcmask 392192   ;;  %v1830_v35 = vld [vmem:[%s2030_s2] ss:$0 sm:$0xff]  ;;  %vm1108_vm2 = vcmask 60416  }
   0xd   : > { %1461 = vmatpush3.bf16.msra.mxu0 %v1606_v0  ;;  %1593 = vmatpush3.bf16.msra.mxu1 %v1606_v0  ;;  %s1705_s24 = scalar_lea.vmem %s2028_s0, %s1232_s21  ;;  %s1839_s29 = scalar_lea.vmem %s2031_s3, %s1232_s21 }
   0xe   : > { %1462 = vmatprep.subr.bf16.mxu0 %v1648_v1  ;;  %1591 = vmatprep.subr.bf16.mxu1 %v1648_v1  ;;  %v1609_v4 = vld [vmem:[%s1705_s24] sm:$0xff]   ;;  %v1611_v6 = vld [vmem:[%s1705_s24 + $0x8] sm:$0xff]   ;;  %v1613_v8 = vld [vmem:[%s1705_s24 + $0x10] sm:$0xff]  }
   0xf   : > { %1466 = vmatprep.mubr.msk.bf16.mxu0 %vm1649_vm0, %v1648_v1  ;;  %1530 = vmatprep.mubr.msk.bf16.mxu1 %vm1649_vm0, %v1648_v1  ;;  %v1610_v5 = vld [vmem:[%s1705_s24 + $0x80] sm:$0xff]   ;;  %v1612_v7 = vld [vmem:[%s1705_s24 + $0x88] sm:$0xff]   ;;  %v1614_v9 = vld [vmem:[%s1705_s24 + $0x90] sm:$0xff]  }
  0x10   : > { %v1615_v10 = vld [vmem:[%s1705_s24 + $0x18] sm:$0xff]   ;;  %v1617_v12 = vld [vmem:[%s1705_s24 + $0x20] sm:$0xff]   ;;  %v1619_v14 = vld [vmem:[%s1705_s24 + $0x28] sm:$0xff]  }
  0x11   : > { %1463 = vmatpush3.bf16.msra.mxu0 %v1607_v2  ;;  %1594 = vmatpush3.bf16.msra.mxu1 %v1607_v2  ;;  %v1616_v11 = vld [vmem:[%s1705_s24 + $0x98] sm:$0xff]   ;;  %v1618_v13 = vld [vmem:[%s1705_s24 + $0xa0] sm:$0xff]   ;;  %v1620_v15 = vld [vmem:[%s1705_s24 + $0xa8] sm:$0xff]  }
  0x12   : > { %1464 = vmatprep.subr.bf16.mxu0 %v1648_v1  ;;  %1592 = vmatprep.subr.bf16.mxu1 %v1648_v1  ;;  %v1621_v16 = vld [vmem:[%s1705_s24 + $0x30] sm:$0xff]   ;;  %v1623_v18 = vld [vmem:[%s1705_s24 + $0x38] sm:$0xff]   ;;  %v1625_v20 = vld [vmem:[%s1705_s24 + $0x40] sm:$0xff]  }
  0x13   : > { %v1622_v17 = vld [vmem:[%s1705_s24 + $0xb0] sm:$0xff]   ;;  %v1624_v19 = vld [vmem:[%s1705_s24 + $0xb8] sm:$0xff]   ;;  %v1626_v21 = vld [vmem:[%s1705_s24 + $0xc0] sm:$0xff]  }
  0x14   : > { %v1627_v22 = vld [vmem:[%s1705_s24 + $0x48] sm:$0xff]   ;;  %v1629_v24 = vld [vmem:[%s1705_s24 + $0x50] sm:$0xff]   ;;  %v1631_v26 = vld [vmem:[%s1705_s24 + $0x58] sm:$0xff]  }
  0x15   : > { %1465 = vmatpush3.bf16.msra.mxu0 %v1608_v3  ;;  %1595 = vmatpush3.bf16.msra.mxu1 %v1608_v3  ;;  %v1628_v23 = vld [vmem:[%s1705_s24 + $0xc8] sm:$0xff]   ;;  %v1630_v25 = vld [vmem:[%s1705_s24 + $0xd0] sm:$0xff]   ;;  %v1632_v27 = vld [vmem:[%s1705_s24 + $0xd8] sm:$0xff]  }
  0x16   : > { %v1633_v28 = vld [vmem:[%s1705_s24 + $0x60] sm:$0xff]   ;;  %v1635_v30 = vld [vmem:[%s1705_s24 + $0x68] sm:$0xff]   ;;  %v1637_v32 = vld [vmem:[%s1705_s24 + $0x70] sm:$0xff]  }
  0x17   : > { %v1634_v29 = vld [vmem:[%s1705_s24 + $0xe0] sm:$0xff]   ;;  %v1636_v31 = vld [vmem:[%s1705_s24 + $0xe8] sm:$0xff]   ;;  %v1638_v33 = vld [vmem:[%s1705_s24 + $0xf0] sm:$0xff]  }
  0x18   : > { %1467 = vmatmul.mubr.msk.bf16.vlgmr.msra.gmra.mxu0 %vm423_vm1, %v1609_v4  ;;  %1531 = vmatmul.mubr.msk.bf16.vlgmr.msra.gmra.mxu1 %vm423_vm1, %v1610_v5  ;;  %v1639_v34 = vld [vmem:[%s1705_s24 + $0x78] sm:$0xff]  }
  0x19   : > { %1470 = vmatprep.mubr.msk.bf16.mxu0 %vm1649_vm0, %v1648_v1  ;;  %1534 = vmatprep.mubr.msk.bf16.mxu1 %vm1649_vm0, %v1648_v1 }
  0x20   : > { %1471 = vmatmul.mubr.msk.bf16.gmra.mxu0 %vm423_vm1, %v1611_v6  ;;  %1535 = vmatmul.mubr.msk.bf16.gmra.mxu1 %vm423_vm1, %v1612_v7 }
  0x21   : > { %1474 = vmatprep.mubr.msk.bf16.mxu0 %vm1649_vm0, %v1648_v1  ;;  %1538 = vmatprep.mubr.msk.bf16.mxu1 %vm1649_vm0, %v1648_v1 }
  0x28   : > { %1475 = vmatmul.mubr.msk.bf16.gmra.mxu0 %vm423_vm1, %v1613_v8  ;;  %1539 = vmatmul.mubr.msk.bf16.gmra.mxu1 %vm423_vm1, %v1614_v9 }
  0x29   : > { %1478 = vmatprep.mubr.msk.bf16.mxu0 %vm1649_vm0, %v1648_v1  ;;  %1542 = vmatprep.mubr.msk.bf16.mxu1 %vm1649_vm0, %v1648_v1 }
  0x30   : > { %1479 = vmatmul.mubr.msk.bf16.gmra.mxu0 %vm423_vm1, %v1615_v10  ;;  %1543 = vmatmul.mubr.msk.bf16.gmra.mxu1 %vm423_vm1, %v1616_v11 }
  0x31   : > { %1482 = vmatprep.mubr.msk.bf16.mxu0 %vm1649_vm0, %v1648_v1  ;;  %1546 = vmatprep.mubr.msk.bf16.mxu1 %vm1649_vm0, %v1648_v1 }
  0x38   : > { %1483 = vmatmul.mubr.msk.bf16.gmra.mxu0 %vm423_vm1, %v1617_v12  ;;  %1547 = vmatmul.mubr.msk.bf16.gmra.mxu1 %vm423_vm1, %v1618_v13 }
  0x39   : > { %1486 = vmatprep.mubr.msk.bf16.mxu0 %vm1649_vm0, %v1648_v1  ;;  %1550 = vmatprep.mubr.msk.bf16.mxu1 %vm1649_vm0, %v1648_v1 }
  0x40   : > { %1487 = vmatmul.mubr.msk.bf16.gmra.mxu0 %vm423_vm1, %v1619_v14  ;;  %1551 = vmatmul.mubr.msk.bf16.gmra.mxu1 %vm423_vm1, %v1620_v15 }
  0x41   : > { %1490 = vmatprep.mubr.msk.bf16.mxu0 %vm1649_vm0, %v1648_v1  ;;  %1554 = vmatprep.mubr.msk.bf16.mxu1 %vm1649_vm0, %v1648_v1 }
  0x48   : > { %1491 = vmatmul.mubr.msk.bf16.gmra.mxu0 %vm423_vm1, %v1621_v16  ;;  %1555 = vmatmul.mubr.msk.bf16.gmra.mxu1 %vm423_vm1, %v1622_v17 }
  0x49   : > { %1494 = vmatprep.mubr.msk.bf16.mxu0 %vm1649_vm0, %v1648_v1  ;;  %1558 = vmatprep.mubr.msk.bf16.mxu1 %vm1649_vm0, %v1648_v1 }
  0x50   : > { %1495 = vmatmul.mubr.msk.bf16.gmra.mxu0 %vm423_vm1, %v1623_v18  ;;  %1559 = vmatmul.mubr.msk.bf16.gmra.mxu1 %vm423_vm1, %v1624_v19 }
  0x51   : > { %1498 = vmatprep.mubr.msk.bf16.mxu0 %vm1649_vm0, %v1648_v1  ;;  %1562 = vmatprep.mubr.msk.bf16.mxu1 %vm1649_vm0, %v1648_v1 }
  0x58   : > { %1499 = vmatmul.mubr.msk.bf16.gmra.mxu0 %vm423_vm1, %v1625_v20  ;;  %1563 = vmatmul.mubr.msk.bf16.gmra.mxu1 %vm423_vm1, %v1626_v21 }
  0x59   : > { %1502 = vmatprep.mubr.msk.bf16.mxu0 %vm1649_vm0, %v1648_v1  ;;  %1566 = vmatprep.mubr.msk.bf16.mxu1 %vm1649_vm0, %v1648_v1 }
  0x60   : > { %1503 = vmatmul.mubr.msk.bf16.gmra.mxu0 %vm423_vm1, %v1627_v22  ;;  %1567 = vmatmul.mubr.msk.bf16.gmra.mxu1 %vm423_vm1, %v1628_v23 }
  0x61   : > { %1506 = vmatprep.mubr.msk.bf16.mxu0 %vm1649_vm0, %v1648_v1  ;;  %1570 = vmatprep.mubr.msk.bf16.mxu1 %vm1649_vm0, %v1648_v1 }
  0x68   : > { %1507 = vmatmul.mubr.msk.bf16.gmra.mxu0 %vm423_vm1, %v1629_v24  ;;  %1571 = vmatmul.mubr.msk.bf16.gmra.mxu1 %vm423_vm1, %v1630_v25 }
  0x69   : > { %1510 = vmatprep.mubr.msk.bf16.mxu0 %vm1649_vm0, %v1648_v1  ;;  %1574 = vmatprep.mubr.msk.bf16.mxu1 %vm1649_vm0, %v1648_v1 }
  0x70   : > { %1511 = vmatmul.mubr.msk.bf16.gmra.mxu0 %vm423_vm1, %v1631_v26  ;;  %1575 = vmatmul.mubr.msk.bf16.gmra.mxu1 %vm423_vm1, %v1632_v27 }
  0x71   : > { %1514 = vmatprep.mubr.msk.bf16.mxu0 %vm1649_vm0, %v1648_v1  ;;  %1578 = vmatprep.mubr.msk.bf16.mxu1 %vm1649_vm0, %v1648_v1 }
  0x78   : > { %1515 = vmatmul.mubr.msk.bf16.gmra.mxu0 %vm423_vm1, %v1633_v28  ;;  %1579 = vmatmul.mubr.msk.bf16.gmra.mxu1 %vm423_vm1, %v1634_v29 }
  0x79   : > { %1518 = vmatprep.mubr.msk.bf16.mxu0 %vm1649_vm0, %v1648_v1  ;;  %1582 = vmatprep.mubr.msk.bf16.mxu1 %vm1649_vm0, %v1648_v1 }
  0x80   : > { %1519 = vmatmul.mubr.msk.bf16.gmra.mxu0 %vm423_vm1, %v1635_v30  ;;  %1583 = vmatmul.mubr.msk.bf16.gmra.mxu1 %vm423_vm1, %v1636_v31 }
  0x81   : > { %1522 = vmatprep.mubr.msk.bf16.mxu0 %vm1649_vm0, %v1648_v1  ;;  %1586 = vmatprep.mubr.msk.bf16.mxu1 %vm1649_vm0, %v1648_v1 }
  0x88   : > { %1523 = vmatmul.mubr.msk.bf16.gmra.mxu0 %vm423_vm1, %v1637_v32  ;;  %1587 = vmatmul.mubr.msk.bf16.gmra.mxu1 %vm423_vm1, %v1638_v33 }
  0x89   : > { %1526 = vmatprep.mubr.msk.bf16.mxu0 %vm1649_vm0, %v1648_v1 }
  0x90   : > { %1527 = vmatmul.mubr.msk.bf16.gmra.mxu0 %vm423_vm1, %v1639_v34 }
  0xd8   : > { %v551_v36 = vpop.f32.mrf.mxu0  ;;  %v679_v37 = vpop.f32.mrf.mxu1 }
  0xd9   : > { %v552_v38 = vadd.f32 %v1830_v35, %v551_v36  ;;  %v680_v39 = vadd.f32 %v1830_v35, %v679_v37 }
  0xda   : > { %v1468_v40 = vpop.f32.mrf.mxu0  ;;  %v1532_v41 = vpop.f32.mrf.mxu1 }
  0xdb   : > { %v798_v42 = vmax.f32 %v552_v38, 0.0  ;;  %v830_v43 = vmax.f32 %v680_v39, 0.0 }
  0xdc   : > { %v554_v44 = vpop.f32.mrf.mxu0  ;;  %v682_v45 = vpop.f32.mrf.mxu1 }
  0xdd   : > { %v1364_v46 = vpack.c.bf16 %v798_v42, %v798_v42  ;;  %v1396_v47 = vpack.c.bf16 %v830_v43, %v830_v43  ;;  %v555_v48 = vadd.f32 %v1830_v35, %v554_v44  ;;  %v683_v49 = vadd.f32 %v1830_v35, %v682_v45 }
  0xde   : > { %v1469_v50 = vpop.f32.mrf.mxu0  ;;  %v1533_v51 = vpop.f32.mrf.mxu1 }
  0xdf   : > { %1109 = vst.msk [vmem:[%s1839_s29] sm:$0xf] %vm1108_vm2, %v1364_v46  ;;  %1141 = vst.msk [vmem:[%s1839_s29 + $0x80] sm:$0xf] %vm1108_vm2, %v1396_v47  ;;  %v799_v52 = vmax.f32 %v555_v48, 0.0  ;;  %v831_v53 = vmax.f32 %v683_v49, 0.0 }
  0xe0   : > { %v559_v54 = vpop.f32.mrf.mxu0  ;;  %v687_v55 = vpop.f32.mrf.mxu1 }
  0xe1   : > { %v1365_v56 = vpack.c.bf16 %v799_v52, %v799_v52  ;;  %v1397_v57 = vpack.c.bf16 %v831_v53, %v831_v53  ;;  %v560_v58 = vadd.f32 %v1830_v35, %v559_v54  ;;  %v688_v59 = vadd.f32 %v1830_v35, %v687_v55 }
  0xe2   : > { %v1472_v60 = vpop.f32.mrf.mxu0  ;;  %v1536_v61 = vpop.f32.mrf.mxu1 }
  0xe3   : > { %1110 = vst.msk [vmem:[%s1839_s29 + $0x4] sm:$0xf] %vm1108_vm2, %v1365_v56  ;;  %1142 = vst.msk [vmem:[%s1839_s29 + $0x84] sm:$0xf] %vm1108_vm2, %v1397_v57  ;;  %v800_v62 = vmax.f32 %v560_v58, 0.0  ;;  %v832_v63 = vmax.f32 %v688_v59, 0.0 }
  0xe4   : > { %v562_v0 = vpop.f32.mrf.mxu0  ;;  %v690_v1 = vpop.f32.mrf.mxu1 }
  0xe5   : > { %v1366_v2 = vpack.c.bf16 %v800_v62, %v800_v62  ;;  %v1398_v3 = vpack.c.bf16 %v832_v63, %v832_v63  ;;  %v563_v4 = vadd.f32 %v1830_v35, %v562_v0  ;;  %v691_v5 = vadd.f32 %v1830_v35, %v690_v1 }
  0xe6   : > { %v1473_v6 = vpop.f32.mrf.mxu0  ;;  %v1537_v7 = vpop.f32.mrf.mxu1 }
  0xe7   : > { %1111 = vst.msk [vmem:[%s1839_s29 + $0x8] sm:$0xf] %vm1108_vm2, %v1366_v2  ;;  %1143 = vst.msk [vmem:[%s1839_s29 + $0x88] sm:$0xf] %vm1108_vm2, %v1398_v3  ;;  %v801_v8 = vmax.f32 %v563_v4, 0.0  ;;  %v833_v9 = vmax.f32 %v691_v5, 0.0 }
  0xe8   : > { %v567_v10 = vpop.f32.mrf.mxu0  ;;  %v695_v11 = vpop.f32.mrf.mxu1 }
  0xe9   : > { %v1367_v12 = vpack.c.bf16 %v801_v8, %v801_v8  ;;  %v1399_v13 = vpack.c.bf16 %v833_v9, %v833_v9  ;;  %v568_v14 = vadd.f32 %v1830_v35, %v567_v10  ;;  %v696_v15 = vadd.f32 %v1830_v35, %v695_v11 }
  0xea   : > { %v1476_v16 = vpop.f32.mrf.mxu0  ;;  %v1540_v17 = vpop.f32.mrf.mxu1 }
  0xeb   : > { %1112 = vst.msk [vmem:[%s1839_s29 + $0xc] sm:$0xf] %vm1108_vm2, %v1367_v12  ;;  %1144 = vst.msk [vmem:[%s1839_s29 + $0x8c] sm:$0xf] %vm1108_vm2, %v1399_v13  ;;  %v802_v18 = vmax.f32 %v568_v14, 0.0  ;;  %v834_v19 = vmax.f32 %v696_v15, 0.0 }
  0xec   : > { %v570_v20 = vpop.f32.mrf.mxu0  ;;  %v698_v21 = vpop.f32.mrf.mxu1 }
  0xed   : > { %v1368_v22 = vpack.c.bf16 %v802_v18, %v802_v18  ;;  %v1400_v23 = vpack.c.bf16 %v834_v19, %v834_v19  ;;  %v571_v24 = vadd.f32 %v1830_v35, %v570_v20  ;;  %v699_v25 = vadd.f32 %v1830_v35, %v698_v21 }
  0xee   : > { %v1477_v26 = vpop.f32.mrf.mxu0  ;;  %v1541_v27 = vpop.f32.mrf.mxu1 }
  0xef   : > { %1113 = vst.msk [vmem:[%s1839_s29 + $0x10] sm:$0xf] %vm1108_vm2, %v1368_v22  ;;  %1145 = vst.msk [vmem:[%s1839_s29 + $0x90] sm:$0xf] %vm1108_vm2, %v1400_v23  ;;  %v803_v28 = vmax.f32 %v571_v24, 0.0  ;;  %v835_v29 = vmax.f32 %v699_v25, 0.0 }
  0xf0   : > { %v575_v30 = vpop.f32.mrf.mxu0  ;;  %v703_v31 = vpop.f32.mrf.mxu1 }
  0xf1   : > { %v1369_v32 = vpack.c.bf16 %v803_v28, %v803_v28  ;;  %v1401_v33 = vpack.c.bf16 %v835_v29, %v835_v29  ;;  %v576_v34 = vadd.f32 %v1830_v35, %v575_v30  ;;  %v704_v36 = vadd.f32 %v1830_v35, %v703_v31 }
  0xf2   : > { %v1480_v37 = vpop.f32.mrf.mxu0  ;;  %v1544_v38 = vpop.f32.mrf.mxu1 }
  0xf3   : > { %1114 = vst.msk [vmem:[%s1839_s29 + $0x14] sm:$0xf] %vm1108_vm2, %v1369_v32  ;;  %1146 = vst.msk [vmem:[%s1839_s29 + $0x94] sm:$0xf] %vm1108_vm2, %v1401_v33  ;;  %v804_v39 = vmax.f32 %v576_v34, 0.0  ;;  %v836_v40 = vmax.f32 %v704_v36, 0.0 }
  0xf4   : > { %v578_v41 = vpop.f32.mrf.mxu0  ;;  %v706_v42 = vpop.f32.mrf.mxu1 }
  0xf5   : > { %v1370_v43 = vpack.c.bf16 %v804_v39, %v804_v39  ;;  %v1402_v44 = vpack.c.bf16 %v836_v40, %v836_v40  ;;  %v579_v45 = vadd.f32 %v1830_v35, %v578_v41  ;;  %v707_v46 = vadd.f32 %v1830_v35, %v706_v42 }
  0xf6   : > { %v1481_v47 = vpop.f32.mrf.mxu0  ;;  %v1545_v48 = vpop.f32.mrf.mxu1 }
  0xf7   : > { %1115 = vst.msk [vmem:[%s1839_s29 + $0x18] sm:$0xf] %vm1108_vm2, %v1370_v43  ;;  %1147 = vst.msk [vmem:[%s1839_s29 + $0x98] sm:$0xf] %vm1108_vm2, %v1402_v44  ;;  %v805_v49 = vmax.f32 %v579_v45, 0.0  ;;  %v837_v50 = vmax.f32 %v707_v46, 0.0 }
  0xf8   : > { %v583_v51 = vpop.f32.mrf.mxu0  ;;  %v711_v52 = vpop.f32.mrf.mxu1 }
  0xf9   : > { %v1371_v53 = vpack.c.bf16 %v805_v49, %v805_v49  ;;  %v1403_v54 = vpack.c.bf16 %v837_v50, %v837_v50  ;;  %v584_v55 = vadd.f32 %v1830_v35, %v583_v51  ;;  %v712_v56 = vadd.f32 %v1830_v35, %v711_v52 }
  0xfa   : > { %v1484_v57 = vpop.f32.mrf.mxu0  ;;  %v1548_v58 = vpop.f32.mrf.mxu1 }
  0xfb   : > { %1116 = vst.msk [vmem:[%s1839_s29 + $0x1c] sm:$0xf] %vm1108_vm2, %v1371_v53  ;;  %1148 = vst.msk [vmem:[%s1839_s29 + $0x9c] sm:$0xf] %vm1108_vm2, %v1403_v54  ;;  %v806_v59 = vmax.f32 %v584_v55, 0.0  ;;  %v838_v60 = vmax.f32 %v712_v56, 0.0 }
  0xfc   : > { %v586_v61 = vpop.f32.mrf.mxu0  ;;  %v714_v62 = vpop.f32.mrf.mxu1 }
  0xfd   : > { %v1372_v63 = vpack.c.bf16 %v806_v59, %v806_v59  ;;  %v1404_v0 = vpack.c.bf16 %v838_v60, %v838_v60  ;;  %v587_v1 = vadd.f32 %v1830_v35, %v586_v61  ;;  %v715_v2 = vadd.f32 %v1830_v35, %v714_v62 }
  0xfe   : > { %v1485_v3 = vpop.f32.mrf.mxu0  ;;  %v1549_v4 = vpop.f32.mrf.mxu1 }
  0xff   : > { %1117 = vst.msk [vmem:[%s1839_s29 + $0x20] sm:$0xf] %vm1108_vm2, %v1372_v63  ;;  %1149 = vst.msk [vmem:[%s1839_s29 + $0xa0] sm:$0xf] %vm1108_vm2, %v1404_v0  ;;  %v807_v5 = vmax.f32 %v587_v1, 0.0  ;;  %v839_v6 = vmax.f32 %v715_v2, 0.0 }
 0x100   : > { %v591_v7 = vpop.f32.mrf.mxu0  ;;  %v719_v8 = vpop.f32.mrf.mxu1 }
 0x101   : > { %v1373_v9 = vpack.c.bf16 %v807_v5, %v807_v5  ;;  %v1405_v10 = vpack.c.bf16 %v839_v6, %v839_v6  ;;  %v592_v11 = vadd.f32 %v1830_v35, %v591_v7  ;;  %v720_v12 = vadd.f32 %v1830_v35, %v719_v8 }
 0x102   : > { %v1488_v13 = vpop.f32.mrf.mxu0  ;;  %v1552_v14 = vpop.f32.mrf.mxu1 }
 0x103   : > { %1118 = vst.msk [vmem:[%s1839_s29 + $0x24] sm:$0xf] %vm1108_vm2, %v1373_v9  ;;  %1150 = vst.msk [vmem:[%s1839_s29 + $0xa4] sm:$0xf] %vm1108_vm2, %v1405_v10  ;;  %v808_v15 = vmax.f32 %v592_v11, 0.0  ;;  %v840_v16 = vmax.f32 %v720_v12, 0.0 }
 0x104   : > { %v594_v17 = vpop.f32.mrf.mxu0  ;;  %v722_v18 = vpop.f32.mrf.mxu1 }
 0x105   : > { %v1374_v19 = vpack.c.bf16 %v808_v15, %v808_v15  ;;  %v1406_v20 = vpack.c.bf16 %v840_v16, %v840_v16  ;;  %v595_v21 = vadd.f32 %v1830_v35, %v594_v17  ;;  %v723_v22 = vadd.f32 %v1830_v35, %v722_v18 }
 0x106   : > { %v1489_v23 = vpop.f32.mrf.mxu0  ;;  %v1553_v24 = vpop.f32.mrf.mxu1 }
 0x107   : > { %1119 = vst.msk [vmem:[%s1839_s29 + $0x28] sm:$0xf] %vm1108_vm2, %v1374_v19  ;;  %1151 = vst.msk [vmem:[%s1839_s29 + $0xa8] sm:$0xf] %vm1108_vm2, %v1406_v20  ;;  %v809_v25 = vmax.f32 %v595_v21, 0.0  ;;  %v841_v26 = vmax.f32 %v723_v22, 0.0 }
 0x108   : > { %v599_v27 = vpop.f32.mrf.mxu0  ;;  %v727_v28 = vpop.f32.mrf.mxu1 }
 0x109   : > { %v1375_v29 = vpack.c.bf16 %v809_v25, %v809_v25  ;;  %v1407_v30 = vpack.c.bf16 %v841_v26, %v841_v26  ;;  %v600_v31 = vadd.f32 %v1830_v35, %v599_v27  ;;  %v728_v32 = vadd.f32 %v1830_v35, %v727_v28 }
 0x10a   : > { %v1492_v33 = vpop.f32.mrf.mxu0  ;;  %v1556_v34 = vpop.f32.mrf.mxu1 }
 0x10b   : > { %1120 = vst.msk [vmem:[%s1839_s29 + $0x2c] sm:$0xf] %vm1108_vm2, %v1375_v29  ;;  %1152 = vst.msk [vmem:[%s1839_s29 + $0xac] sm:$0xf] %vm1108_vm2, %v1407_v30  ;;  %v810_v36 = vmax.f32 %v600_v31, 0.0  ;;  %v842_v37 = vmax.f32 %v728_v32, 0.0 }
 0x10c   : > { %v602_v38 = vpop.f32.mrf.mxu0  ;;  %v730_v39 = vpop.f32.mrf.mxu1 }
 0x10d   : > { %v1376_v40 = vpack.c.bf16 %v810_v36, %v810_v36  ;;  %v1408_v41 = vpack.c.bf16 %v842_v37, %v842_v37  ;;  %v603_v42 = vadd.f32 %v1830_v35, %v602_v38  ;;  %v731_v43 = vadd.f32 %v1830_v35, %v730_v39 }
 0x10e   : > { %v1493_v44 = vpop.f32.mrf.mxu0  ;;  %v1557_v45 = vpop.f32.mrf.mxu1 }
 0x10f   : > { %1121 = vst.msk [vmem:[%s1839_s29 + $0x30] sm:$0xf] %vm1108_vm2, %v1376_v40  ;;  %1153 = vst.msk [vmem:[%s1839_s29 + $0xb0] sm:$0xf] %vm1108_vm2, %v1408_v41  ;;  %v811_v46 = vmax.f32 %v603_v42, 0.0  ;;  %v843_v47 = vmax.f32 %v731_v43, 0.0 }
 0x110   : > { %v607_v48 = vpop.f32.mrf.mxu0  ;;  %v735_v49 = vpop.f32.mrf.mxu1 }
 0x111   : > { %v1377_v50 = vpack.c.bf16 %v811_v46, %v811_v46  ;;  %v1409_v51 = vpack.c.bf16 %v843_v47, %v843_v47  ;;  %v608_v52 = vadd.f32 %v1830_v35, %v607_v48  ;;  %v736_v53 = vadd.f32 %v1830_v35, %v735_v49 }
 0x112   : > { %v1496_v54 = vpop.f32.mrf.mxu0  ;;  %v1560_v55 = vpop.f32.mrf.mxu1 }
 0x113   : > { %1122 = vst.msk [vmem:[%s1839_s29 + $0x34] sm:$0xf] %vm1108_vm2, %v1377_v50  ;;  %1154 = vst.msk [vmem:[%s1839_s29 + $0xb4] sm:$0xf] %vm1108_vm2, %v1409_v51  ;;  %v812_v56 = vmax.f32 %v608_v52, 0.0  ;;  %v844_v57 = vmax.f32 %v736_v53, 0.0 }
 0x114   : > { %v610_v58 = vpop.f32.mrf.mxu0  ;;  %v738_v59 = vpop.f32.mrf.mxu1 }
 0x115   : > { %v1378_v60 = vpack.c.bf16 %v812_v56, %v812_v56  ;;  %v1410_v61 = vpack.c.bf16 %v844_v57, %v844_v57  ;;  %v611_v62 = vadd.f32 %v1830_v35, %v610_v58  ;;  %v739_v63 = vadd.f32 %v1830_v35, %v738_v59 }
 0x116   : > { %v1497_v0 = vpop.f32.mrf.mxu0  ;;  %v1561_v1 = vpop.f32.mrf.mxu1 }
 0x117   : > { %1123 = vst.msk [vmem:[%s1839_s29 + $0x38] sm:$0xf] %vm1108_vm2, %v1378_v60  ;;  %1155 = vst.msk [vmem:[%s1839_s29 + $0xb8] sm:$0xf] %vm1108_vm2, %v1410_v61  ;;  %v813_v2 = vmax.f32 %v611_v62, 0.0  ;;  %v845_v3 = vmax.f32 %v739_v63, 0.0 }
 0x118   : > { %v615_v4 = vpop.f32.mrf.mxu0  ;;  %v743_v5 = vpop.f32.mrf.mxu1 }
 0x119   : > { %v1379_v6 = vpack.c.bf16 %v813_v2, %v813_v2  ;;  %v1411_v7 = vpack.c.bf16 %v845_v3, %v845_v3  ;;  %v616_v8 = vadd.f32 %v1830_v35, %v615_v4  ;;  %v744_v9 = vadd.f32 %v1830_v35, %v743_v5 }
 0x11a   : > { %v1500_v10 = vpop.f32.mrf.mxu0  ;;  %v1564_v11 = vpop.f32.mrf.mxu1 }
 0x11b   : > { %1124 = vst.msk [vmem:[%s1839_s29 + $0x3c] sm:$0xf] %vm1108_vm2, %v1379_v6  ;;  %1156 = vst.msk [vmem:[%s1839_s29 + $0xbc] sm:$0xf] %vm1108_vm2, %v1411_v7  ;;  %v814_v12 = vmax.f32 %v616_v8, 0.0  ;;  %v846_v13 = vmax.f32 %v744_v9, 0.0 }
 0x11c   : > { %v618_v14 = vpop.f32.mrf.mxu0  ;;  %v746_v15 = vpop.f32.mrf.mxu1 }
 0x11d   : > { %v1380_v16 = vpack.c.bf16 %v814_v12, %v814_v12  ;;  %v1412_v17 = vpack.c.bf16 %v846_v13, %v846_v13  ;;  %v619_v18 = vadd.f32 %v1830_v35, %v618_v14  ;;  %v747_v19 = vadd.f32 %v1830_v35, %v746_v15 }
 0x11e   : > { %v1501_v20 = vpop.f32.mrf.mxu0  ;;  %v1565_v21 = vpop.f32.mrf.mxu1 }
 0x11f   : > { %1125 = vst.msk [vmem:[%s1839_s29 + $0x40] sm:$0xf] %vm1108_vm2, %v1380_v16  ;;  %1157 = vst.msk [vmem:[%s1839_s29 + $0xc0] sm:$0xf] %vm1108_vm2, %v1412_v17  ;;  %v815_v22 = vmax.f32 %v619_v18, 0.0  ;;  %v847_v23 = vmax.f32 %v747_v19, 0.0 }
 0x120   : > { %v623_v24 = vpop.f32.mrf.mxu0  ;;  %v751_v25 = vpop.f32.mrf.mxu1 }
 0x121   : > { %v1381_v26 = vpack.c.bf16 %v815_v22, %v815_v22  ;;  %v1413_v27 = vpack.c.bf16 %v847_v23, %v847_v23  ;;  %v624_v28 = vadd.f32 %v1830_v35, %v623_v24  ;;  %v752_v29 = vadd.f32 %v1830_v35, %v751_v25 }
 0x122   : > { %v1504_v30 = vpop.f32.mrf.mxu0  ;;  %v1568_v31 = vpop.f32.mrf.mxu1 }
 0x123   : > { %1126 = vst.msk [vmem:[%s1839_s29 + $0x44] sm:$0xf] %vm1108_vm2, %v1381_v26  ;;  %1158 = vst.msk [vmem:[%s1839_s29 + $0xc4] sm:$0xf] %vm1108_vm2, %v1413_v27  ;;  %v816_v32 = vmax.f32 %v624_v28, 0.0  ;;  %v848_v33 = vmax.f32 %v752_v29, 0.0 }
 0x124   : > { %v626_v34 = vpop.f32.mrf.mxu0  ;;  %v754_v36 = vpop.f32.mrf.mxu1 }
 0x125   : > { %v1382_v37 = vpack.c.bf16 %v816_v32, %v816_v32  ;;  %v1414_v38 = vpack.c.bf16 %v848_v33, %v848_v33  ;;  %v627_v39 = vadd.f32 %v1830_v35, %v626_v34  ;;  %v755_v40 = vadd.f32 %v1830_v35, %v754_v36 }
 0x126   : > { %v1505_v41 = vpop.f32.mrf.mxu0  ;;  %v1569_v42 = vpop.f32.mrf.mxu1 }
 0x127   : > { %1127 = vst.msk [vmem:[%s1839_s29 + $0x48] sm:$0xf] %vm1108_vm2, %v1382_v37  ;;  %1159 = vst.msk [vmem:[%s1839_s29 + $0xc8] sm:$0xf] %vm1108_vm2, %v1414_v38  ;;  %v817_v43 = vmax.f32 %v627_v39, 0.0  ;;  %v849_v44 = vmax.f32 %v755_v40, 0.0 }
 0x128   : > { %v631_v45 = vpop.f32.mrf.mxu0  ;;  %v759_v46 = vpop.f32.mrf.mxu1 }
 0x129   : > { %v1383_v47 = vpack.c.bf16 %v817_v43, %v817_v43  ;;  %v1415_v48 = vpack.c.bf16 %v849_v44, %v849_v44  ;;  %v632_v49 = vadd.f32 %v1830_v35, %v631_v45  ;;  %v760_v50 = vadd.f32 %v1830_v35, %v759_v46 }
 0x12a   : > { %v1508_v51 = vpop.f32.mrf.mxu0  ;;  %v1572_v52 = vpop.f32.mrf.mxu1 }
 0x12b   : > { %1128 = vst.msk [vmem:[%s1839_s29 + $0x4c] sm:$0xf] %vm1108_vm2, %v1383_v47  ;;  %1160 = vst.msk [vmem:[%s1839_s29 + $0xcc] sm:$0xf] %vm1108_vm2, %v1415_v48  ;;  %v818_v53 = vmax.f32 %v632_v49, 0.0  ;;  %v850_v54 = vmax.f32 %v760_v50, 0.0 }
 0x12c   : > { %v634_v55 = vpop.f32.mrf.mxu0  ;;  %v762_v56 = vpop.f32.mrf.mxu1 }
 0x12d   : > { %v1384_v57 = vpack.c.bf16 %v818_v53, %v818_v53  ;;  %v1416_v58 = vpack.c.bf16 %v850_v54, %v850_v54  ;;  %v635_v59 = vadd.f32 %v1830_v35, %v634_v55  ;;  %v763_v60 = vadd.f32 %v1830_v35, %v762_v56 }
 0x12e   : > { %v1509_v61 = vpop.f32.mrf.mxu0  ;;  %v1573_v62 = vpop.f32.mrf.mxu1 }
 0x12f   : > { %1129 = vst.msk [vmem:[%s1839_s29 + $0x50] sm:$0xf] %vm1108_vm2, %v1384_v57  ;;  %1161 = vst.msk [vmem:[%s1839_s29 + $0xd0] sm:$0xf] %vm1108_vm2, %v1416_v58  ;;  %v819_v63 = vmax.f32 %v635_v59, 0.0  ;;  %v851_v0 = vmax.f32 %v763_v60, 0.0 }
 0x130   : > { %v639_v1 = vpop.f32.mrf.mxu0  ;;  %v767_v2 = vpop.f32.mrf.mxu1 }
 0x131   : > { %v1385_v3 = vpack.c.bf16 %v819_v63, %v819_v63  ;;  %v1417_v4 = vpack.c.bf16 %v851_v0, %v851_v0  ;;  %v640_v5 = vadd.f32 %v1830_v35, %v639_v1  ;;  %v768_v6 = vadd.f32 %v1830_v35, %v767_v2 }
 0x132   : > { %v1512_v7 = vpop.f32.mrf.mxu0  ;;  %v1576_v8 = vpop.f32.mrf.mxu1 }
 0x133   : > { %1130 = vst.msk [vmem:[%s1839_s29 + $0x54] sm:$0xf] %vm1108_vm2, %v1385_v3  ;;  %1162 = vst.msk [vmem:[%s1839_s29 + $0xd4] sm:$0xf] %vm1108_vm2, %v1417_v4  ;;  %v820_v9 = vmax.f32 %v640_v5, 0.0  ;;  %v852_v10 = vmax.f32 %v768_v6, 0.0 }
 0x134   : > { %v642_v11 = vpop.f32.mrf.mxu0  ;;  %v770_v12 = vpop.f32.mrf.mxu1 }
 0x135   : > { %v1386_v13 = vpack.c.bf16 %v820_v9, %v820_v9  ;;  %v1418_v14 = vpack.c.bf16 %v852_v10, %v852_v10  ;;  %v643_v15 = vadd.f32 %v1830_v35, %v642_v11  ;;  %v771_v16 = vadd.f32 %v1830_v35, %v770_v12 }
 0x136   : > { %v1513_v17 = vpop.f32.mrf.mxu0  ;;  %v1577_v18 = vpop.f32.mrf.mxu1 }
 0x137   : > { %1131 = vst.msk [vmem:[%s1839_s29 + $0x58] sm:$0xf] %vm1108_vm2, %v1386_v13  ;;  %1163 = vst.msk [vmem:[%s1839_s29 + $0xd8] sm:$0xf] %vm1108_vm2, %v1418_v14  ;;  %v821_v19 = vmax.f32 %v643_v15, 0.0  ;;  %v853_v20 = vmax.f32 %v771_v16, 0.0 }
 0x138   : > { %v647_v21 = vpop.f32.mrf.mxu0  ;;  %v775_v22 = vpop.f32.mrf.mxu1 }
 0x139   : > { %v1387_v23 = vpack.c.bf16 %v821_v19, %v821_v19  ;;  %v1419_v24 = vpack.c.bf16 %v853_v20, %v853_v20  ;;  %v648_v25 = vadd.f32 %v1830_v35, %v647_v21  ;;  %v776_v26 = vadd.f32 %v1830_v35, %v775_v22 }
 0x13a   : > { %v1516_v27 = vpop.f32.mrf.mxu0  ;;  %v1580_v28 = vpop.f32.mrf.mxu1 }
 0x13b   : > { %1132 = vst.msk [vmem:[%s1839_s29 + $0x5c] sm:$0xf] %vm1108_vm2, %v1387_v23  ;;  %1164 = vst.msk [vmem:[%s1839_s29 + $0xdc] sm:$0xf] %vm1108_vm2, %v1419_v24  ;;  %v822_v29 = vmax.f32 %v648_v25, 0.0  ;;  %v854_v30 = vmax.f32 %v776_v26, 0.0 }
 0x13c   : > { %v650_v31 = vpop.f32.mrf.mxu0  ;;  %v778_v32 = vpop.f32.mrf.mxu1 }
 0x13d   : > { %v1388_v33 = vpack.c.bf16 %v822_v29, %v822_v29  ;;  %v1420_v34 = vpack.c.bf16 %v854_v30, %v854_v30  ;;  %v651_v36 = vadd.f32 %v1830_v35, %v650_v31  ;;  %v779_v37 = vadd.f32 %v1830_v35, %v778_v32 }
 0x13e   : > { %v1517_v38 = vpop.f32.mrf.mxu0  ;;  %v1581_v39 = vpop.f32.mrf.mxu1 }
 0x13f   : > { %1133 = vst.msk [vmem:[%s1839_s29 + $0x60] sm:$0xf] %vm1108_vm2, %v1388_v33  ;;  %1165 = vst.msk [vmem:[%s1839_s29 + $0xe0] sm:$0xf] %vm1108_vm2, %v1420_v34  ;;  %v823_v40 = vmax.f32 %v651_v36, 0.0  ;;  %v855_v41 = vmax.f32 %v779_v37, 0.0 }
 0x140   : > { %v655_v42 = vpop.f32.mrf.mxu0  ;;  %v783_v43 = vpop.f32.mrf.mxu1 }
 0x141   : > { %v1389_v44 = vpack.c.bf16 %v823_v40, %v823_v40  ;;  %v1421_v45 = vpack.c.bf16 %v855_v41, %v855_v41  ;;  %v656_v46 = vadd.f32 %v1830_v35, %v655_v42  ;;  %v784_v47 = vadd.f32 %v1830_v35, %v783_v43 }
 0x142   : > { %v1520_v48 = vpop.f32.mrf.mxu0  ;;  %v1584_v49 = vpop.f32.mrf.mxu1 }
 0x143   : > { %1134 = vst.msk [vmem:[%s1839_s29 + $0x64] sm:$0xf] %vm1108_vm2, %v1389_v44  ;;  %1166 = vst.msk [vmem:[%s1839_s29 + $0xe4] sm:$0xf] %vm1108_vm2, %v1421_v45  ;;  %v824_v50 = vmax.f32 %v656_v46, 0.0  ;;  %v856_v51 = vmax.f32 %v784_v47, 0.0 }
 0x144   : > { %v658_v52 = vpop.f32.mrf.mxu0  ;;  %v786_v53 = vpop.f32.mrf.mxu1 }
 0x145   : > { %v1390_v54 = vpack.c.bf16 %v824_v50, %v824_v50  ;;  %v1422_v55 = vpack.c.bf16 %v856_v51, %v856_v51  ;;  %v659_v56 = vadd.f32 %v1830_v35, %v658_v52  ;;  %v787_v57 = vadd.f32 %v1830_v35, %v786_v53 }
 0x146   : > { %v1521_v58 = vpop.f32.mrf.mxu0  ;;  %v1585_v59 = vpop.f32.mrf.mxu1 }
 0x147   : > { %1135 = vst.msk [vmem:[%s1839_s29 + $0x68] sm:$0xf] %vm1108_vm2, %v1390_v54  ;;  %1167 = vst.msk [vmem:[%s1839_s29 + $0xe8] sm:$0xf] %vm1108_vm2, %v1422_v55  ;;  %v825_v60 = vmax.f32 %v659_v56, 0.0  ;;  %v857_v61 = vmax.f32 %v787_v57, 0.0 }
 0x148   : > { %v663_v62 = vpop.f32.mrf.mxu0  ;;  %v791_v63 = vpop.f32.mrf.mxu1 }
 0x149   : > { %v1391_v0 = vpack.c.bf16 %v825_v60, %v825_v60  ;;  %v1423_v1 = vpack.c.bf16 %v857_v61, %v857_v61  ;;  %v664_v2 = vadd.f32 %v1830_v35, %v663_v62  ;;  %v792_v3 = vadd.f32 %v1830_v35, %v791_v63 }
 0x14a   : > { %v1524_v4 = vpop.f32.mrf.mxu0  ;;  %v1588_v5 = vpop.f32.mrf.mxu1 }
 0x14b   : > { %1136 = vst.msk [vmem:[%s1839_s29 + $0x6c] sm:$0xf] %vm1108_vm2, %v1391_v0  ;;  %1168 = vst.msk [vmem:[%s1839_s29 + $0xec] sm:$0xf] %vm1108_vm2, %v1423_v1  ;;  %v826_v6 = vmax.f32 %v664_v2, 0.0  ;;  %v858_v7 = vmax.f32 %v792_v3, 0.0 }
 0x14c   : > { %v666_v8 = vpop.f32.mrf.mxu0  ;;  %v794_v9 = vpop.f32.mrf.mxu1 }
 0x14d   : > { %v1392_v10 = vpack.c.bf16 %v826_v6, %v826_v6  ;;  %v1424_v11 = vpack.c.bf16 %v858_v7, %v858_v7  ;;  %v667_v12 = vadd.f32 %v1830_v35, %v666_v8  ;;  %v795_v13 = vadd.f32 %v1830_v35, %v794_v9 }
 0x14e   : > { %v1525_v14 = vpop.f32.mrf.mxu0  ;;  %v1589_v15 = vpop.f32.mrf.mxu1 }
 0x14f   : > { %1137 = vst.msk [vmem:[%s1839_s29 + $0x70] sm:$0xf] %vm1108_vm2, %v1392_v10  ;;  %1169 = vst.msk [vmem:[%s1839_s29 + $0xf0] sm:$0xf] %vm1108_vm2, %v1424_v11  ;;  %v827_v16 = vmax.f32 %v667_v12, 0.0  ;;  %v859_v17 = vmax.f32 %v795_v13, 0.0 }
 0x150   : > { %v671_v18 = vpop.f32.mrf.mxu0 }
 0x151   : > { %v1393_v19 = vpack.c.bf16 %v827_v16, %v827_v16  ;;  %v1425_v20 = vpack.c.bf16 %v859_v17, %v859_v17  ;;  %v672_v21 = vadd.f32 %v1830_v35, %v671_v18 }
 0x152   : > { %v1528_v22 = vpop.f32.mrf.mxu0 }
 0x153   : > { %1138 = vst.msk [vmem:[%s1839_s29 + $0x74] sm:$0xf] %vm1108_vm2, %v1393_v19  ;;  %1170 = vst.msk [vmem:[%s1839_s29 + $0xf4] sm:$0xf] %vm1108_vm2, %v1425_v20  ;;  %v828_v23 = vmax.f32 %v672_v21, 0.0 }
 0x154   : > { %v674_v24 = vpop.f32.mrf.mxu0 }
 0x155   : > { %v1394_v25 = vpack.c.bf16 %v828_v23, %v828_v23  ;;  %v675_v26 = vadd.f32 %v1830_v35, %v674_v24 }
 0x156   : > { %v1529_v27 = vpop.f32.mrf.mxu0 }
 0x157   : > { %1139 = vst.msk [vmem:[%s1839_s29 + $0x78] sm:$0xf] %vm1108_vm2, %v1394_v25  ;;  %v829_v28 = vmax.f32 %v675_v26, 0.0 }
 0x159   : > { %v1395_v29 = vpack.c.bf16 %v829_v28, %v829_v28 }
 0x15b   : > { %1140 = vst.msk [vmem:[%s1839_s29 + $0x7c] sm:$0xf] %vm1108_vm2, %v1395_v29 }
 0x15c PF: > { %s13_s12 = sadd.s32 1, %s1646_s12  }
 0x15d   : > { %p10_p4 = scmp.ge.s32.totalorder %s13_s12, 14  }
 0x15f   :  { %12 = sbr.rel (!%p10_p4) target bundleno = 1 (0x1), region = 62 }

// kernel: encoder_forward.5
= control target key start
LH: loop header
LB: loop body
LE: loop exit
PB: predicated region body
PF: predicated region fallthrough
CT: control target
= control target key end

     0   :  { %s1417_s12 = smov 0   ;;  %s1715_s0 = inlined_call_operand.vmem [shape: bf16[1200,128], index: 0, kind: input, shape index: {}]   ;;  %s1716_s1 = inlined_call_operand.vmem [shape: bf16[128,16], index: 1, kind: input, shape index: {}]   ;;  %s1717_s2 = inlined_call_operand.vmem [shape: f32[1,16], index: 2, kind: input, shape index: {}]   ;;  %s1718_s3 = inlined_call_operand.vmem [shape: bf16[1200,16], index: 3, kind: output, shape index: {}]  }
   0x1 LB: > { %s1036_s13 = sadd.s32 4294967295, %s1393_s12   ;;  %p1040_p0 = scmp.ge.s32.totalorder %s1393_s12, 1  ;;  %s1393_s12 = sphi %s1417_s12, %s13_s12  }
   0x2   : > { %p138_p1 = scmp.lt.s32.totalorder %s1393_s12, 4 }
   0x4   : > { %p139_p2 = pnand %p1040_p0, %p138_p1 }
   0x5   : > { %s162_s18 = smul.u32 (!%p139_p2), 50, %s1036_s13 }
   0x6   : > { %142 = sbr.rel (%p139_p2) target bundleno = 344 (0x158), region = 32 }
   0x7   : > { %p163_p3 = scmp.lt.s32.totalorder (!%p139_p2), %s162_s18, 149 }
   0xb   : > { %v1354_v0 = vld [vmem:[%s1716_s1 + $0x38] sm:$0xff]   ;;  %v1395_v1 = vmov 0.0   ;;  %v1355_v2 = vld [vmem:[%s1716_s1 + $0x30] sm:$0xff]   ;;  %vm1396_vm0 = vmmov 0   ;;  %v1356_v3 = vld [vmem:[%s1716_s1 + $0x28] sm:$0xff]   ;;  %s1720_s18 = smov (!%p163_p3, %s162_s18), 149 }
   0xc   : > { %1212 = vmatprep.subr.bf16.mxu0 %v1395_v1  ;;  %1328 = vmatprep.subr.bf16.mxu1 %v1395_v1  ;;  %s1041_s21 = sshll.u32 %s1720_s18, 2  ;;  %v1357_v4 = vld [vmem:[%s1716_s1 + $0x20] sm:$0xff]   ;;  %v1358_v5 = vld [vmem:[%s1716_s1 + $0x18] sm:$0xff]   ;;  %v1359_v6 = vld [vmem:[%s1716_s1 + $0x10] sm:$0xff]   ;;  %vm929_vm1 = vcmask 125952  }
   0xd   : > { %1213 = vmatpush3.bf16.msra.mxu0 %v1354_v0  ;;  %1336 = vmatpush3.bf16.msra.mxu1 %v1354_v0  ;;  %s1452_s24 = scalar_lea.vmem %s1715_s0, %s1041_s21  ;;  %v1360_v7 = vld [vmem:[%s1716_s1 + $0x8] sm:$0xff]   ;;  %v1361_v8 = vld [vmem:[%s1716_s1] sm:$0xff]   ;;  %s1562_s13 = scalar_lea.vmem %s1718_s3, %s1041_s21 }
   0xe   : > { %1214 = vmatprep.subr.bf16.mxu0 %v1395_v1  ;;  %1329 = vmatprep.subr.bf16.mxu1 %v1395_v1  ;;  %v1362_v9 = vld [vmem:[%s1452_s24] sm:$0xff]   ;;  %v1363_v10 = vld [vmem:[%s1452_s24 + $0x68] sm:$0xff]   ;;  %v1365_v12 = vld [vmem:[%s1452_s24 + $0x70] sm:$0xff]  }
   0xf   : > { %1228 = vmatprep.mubr.msk.bf16.mxu0 %vm1396_vm0, %v1395_v1  ;;  %1280 = vmatprep.mubr.msk.bf16.mxu1 %vm1396_vm0, %v1395_v1  ;;  %v1364_v11 = vld [vmem:[%s1452_s24 + $0x8] sm:$0xff]   ;;  %v1366_v13 = vld [vmem:[%s1452_s24 + $0x10] sm:$0xff]   ;;  %v1367_v14 = vld [vmem:[%s1452_s24 + $0x78] sm:$0xff]  }
  0x10   : > { %v1368_v15 = vld [vmem:[%s1452_s24 + $0x18] sm:$0xff]   ;;  %v1369_v16 = vld [vmem:[%s1452_s24 + $0x80] sm:$0xff]   ;;  %v1371_v18 = vld [vmem:[%s1452_s24 + $0x88] sm:$0xff]  }
  0x11   : > { %1215 = vmatpush3.bf16.msra.mxu0 %v1355_v2  ;;  %1337 = vmatpush3.bf16.msra.mxu1 %v1355_v2  ;;  %v1370_v17 = vld [vmem:[%s1452_s24 + $0x20] sm:$0xff]   ;;  %v1372_v19 = vld [vmem:[%s1452_s24 + $0x28] sm:$0xff]   ;;  %v1373_v20 = vld [vmem:[%s1452_s24 + $0x90] sm:$0xff]  }
  0x12   : > { %1216 = vmatprep.subr.bf16.mxu0 %v1395_v1  ;;  %1330 = vmatprep.subr.bf16.mxu1 %v1395_v1  ;;  %v1374_v21 = vld [vmem:[%s1452_s24 + $0x30] sm:$0xff]   ;;  %v1375_v22 = vld [vmem:[%s1452_s24 + $0x98] sm:$0xff]   ;;  %v1377_v24 = vld [vmem:[%s1452_s24 + $0xa0] sm:$0xff]  }
  0x13   : > { %v1376_v23 = vld [vmem:[%s1452_s24 + $0x38] sm:$0xff]   ;;  %v1378_v25 = vld [vmem:[%s1452_s24 + $0x40] sm:$0xff]   ;;  %v1379_v26 = vld [vmem:[%s1452_s24 + $0xa8] sm:$0xff]  }
  0x14   : > { %v1380_v27 = vld [vmem:[%s1452_s24 + $0x48] sm:$0xff]   ;;  %v1381_v28 = vld [vmem:[%s1452_s24 + $0xb0] sm:$0xff]   ;;  %v1383_v30 = vld [vmem:[%s1452_s24 + $0xb8] sm:$0xff]  }
  0x15   : > { %1217 = vmatpush3.bf16.msra.mxu0 %v1356_v3  ;;  %1338 = vmatpush3.bf16.msra.mxu1 %v1356_v3  ;;  %v1382_v29 = vld [vmem:[%s1452_s24 + $0x50] sm:$0xff]   ;;  %v1384_v31 = vld [vmem:[%s1452_s24 + $0x58] sm:$0xff]   ;;  %v1385_v32 = vld [vmem:[%s1452_s24 + $0xc0] sm:$0xff]  }
  0x16   : > { %1218 = vmatprep.subr.bf16.mxu0 %v1395_v1  ;;  %1331 = vmatprep.subr.bf16.mxu1 %v1395_v1  ;;  %v1386_v33 = vld [vmem:[%s1452_s24 + $0x60] sm:$0xff]  }
  0x17   : > { %v1553_v34 = vld [vmem:[%s1717_s2] ss:$0 sm:$0xff] }
  0x19   : > { %1219 = vmatpush3.bf16.msra.mxu0 %v1357_v4  ;;  %1339 = vmatpush3.bf16.msra.mxu1 %v1357_v4 }
  0x1a   : > { %1220 = vmatprep.subr.bf16.mxu0 %v1395_v1  ;;  %1332 = vmatprep.subr.bf16.mxu1 %v1395_v1 }
  0x1d   : > { %1221 = vmatpush3.bf16.msra.mxu0 %v1358_v5  ;;  %1340 = vmatpush3.bf16.msra.mxu1 %v1358_v5 }
  0x1e   : > { %1222 = vmatprep.subr.bf16.mxu0 %v1395_v1  ;;  %1333 = vmatprep.subr.bf16.mxu1 %v1395_v1 }
  0x21   : > { %1223 = vmatpush3.bf16.msra.mxu0 %v1359_v6  ;;  %1341 = vmatpush3.bf16.msra.mxu1 %v1359_v6 }
  0x22   : > { %1224 = vmatprep.subr.bf16.mxu0 %v1395_v1  ;;  %1334 = vmatprep.subr.bf16.mxu1 %v1395_v1 }
  0x25   : > { %1225 = vmatpush3.bf16.msra.mxu0 %v1360_v7  ;;  %1342 = vmatpush3.bf16.msra.mxu1 %v1360_v7 }
  0x26   : > { %1226 = vmatprep.subr.bf16.mxu0 %v1395_v1  ;;  %1335 = vmatprep.subr.bf16.mxu1 %v1395_v1 }
  0x29   : > { %1227 = vmatpush3.bf16.msra.mxu0 %v1361_v8  ;;  %1343 = vmatpush3.bf16.msra.mxu1 %v1361_v8 }
  0x2c   : > { %1229 = vmatmul.mubr.bf16.vlgmr.msra.gmra.mxu0 %v1362_v9  ;;  %1281 = vmatmul.mubr.bf16.vlgmr.msra.gmra.mxu1 %v1363_v10 }
  0x2d   : > { %1232 = vmatprep.mubr.msk.bf16.mxu0 %vm1396_vm0, %v1395_v1  ;;  %1284 = vmatprep.mubr.msk.bf16.mxu1 %vm1396_vm0, %v1395_v1 }
  0x34   : > { %1233 = vmatmul.mubr.bf16.gmra.mxu0 %v1364_v11  ;;  %1285 = vmatmul.mubr.bf16.gmra.mxu1 %v1365_v12 }
  0x35   : > { %1236 = vmatprep.mubr.msk.bf16.mxu0 %vm1396_vm0, %v1395_v1  ;;  %1288 = vmatprep.mubr.msk.bf16.mxu1 %vm1396_vm0, %v1395_v1 }
  0x3c   : > { %1237 = vmatmul.mubr.bf16.gmra.mxu0 %v1366_v13  ;;  %1289 = vmatmul.mubr.bf16.gmra.mxu1 %v1367_v14 }
  0x3d   : > { %1240 = vmatprep.mubr.msk.bf16.mxu0 %vm1396_vm0, %v1395_v1  ;;  %1292 = vmatprep.mubr.msk.bf16.mxu1 %vm1396_vm0, %v1395_v1 }
  0x44   : > { %1241 = vmatmul.mubr.bf16.gmra.mxu0 %v1368_v15  ;;  %1293 = vmatmul.mubr.bf16.gmra.mxu1 %v1369_v16 }
  0x45   : > { %1244 = vmatprep.mubr.msk.bf16.mxu0 %vm1396_vm0, %v1395_v1  ;;  %1296 = vmatprep.mubr.msk.bf16.mxu1 %vm1396_vm0, %v1395_v1 }
  0x4c   : > { %1245 = vmatmul.mubr.bf16.gmra.mxu0 %v1370_v17  ;;  %1297 = vmatmul.mubr.bf16.gmra.mxu1 %v1371_v18 }
  0x4d   : > { %1248 = vmatprep.mubr.msk.bf16.mxu0 %vm1396_vm0, %v1395_v1  ;;  %1300 = vmatprep.mubr.msk.bf16.mxu1 %vm1396_vm0, %v1395_v1 }
  0x54   : > { %1249 = vmatmul.mubr.bf16.gmra.mxu0 %v1372_v19  ;;  %1301 = vmatmul.mubr.bf16.gmra.mxu1 %v1373_v20 }
  0x55   : > { %1252 = vmatprep.mubr.msk.bf16.mxu0 %vm1396_vm0, %v1395_v1  ;;  %1304 = vmatprep.mubr.msk.bf16.mxu1 %vm1396_vm0, %v1395_v1 }
  0x5c   : > { %1253 = vmatmul.mubr.bf16.gmra.mxu0 %v1374_v21  ;;  %1305 = vmatmul.mubr.bf16.gmra.mxu1 %v1375_v22 }
  0x5d   : > { %1256 = vmatprep.mubr.msk.bf16.mxu0 %vm1396_vm0, %v1395_v1  ;;  %1308 = vmatprep.mubr.msk.bf16.mxu1 %vm1396_vm0, %v1395_v1 }
  0x64   : > { %1257 = vmatmul.mubr.bf16.gmra.mxu0 %v1376_v23  ;;  %1309 = vmatmul.mubr.bf16.gmra.mxu1 %v1377_v24 }
  0x65   : > { %1260 = vmatprep.mubr.msk.bf16.mxu0 %vm1396_vm0, %v1395_v1  ;;  %1312 = vmatprep.mubr.msk.bf16.mxu1 %vm1396_vm0, %v1395_v1 }
  0x6c   : > { %1261 = vmatmul.mubr.bf16.gmra.mxu0 %v1378_v25  ;;  %1313 = vmatmul.mubr.bf16.gmra.mxu1 %v1379_v26 }
  0x6d   : > { %1264 = vmatprep.mubr.msk.bf16.mxu0 %vm1396_vm0, %v1395_v1  ;;  %1316 = vmatprep.mubr.msk.bf16.mxu1 %vm1396_vm0, %v1395_v1 }
  0x74   : > { %1265 = vmatmul.mubr.bf16.gmra.mxu0 %v1380_v27  ;;  %1317 = vmatmul.mubr.bf16.gmra.mxu1 %v1381_v28 }
  0x75   : > { %1268 = vmatprep.mubr.msk.bf16.mxu0 %vm1396_vm0, %v1395_v1  ;;  %1320 = vmatprep.mubr.msk.bf16.mxu1 %vm1396_vm0, %v1395_v1 }
  0x7c   : > { %1269 = vmatmul.mubr.bf16.gmra.mxu0 %v1382_v29  ;;  %1321 = vmatmul.mubr.bf16.gmra.mxu1 %v1383_v30 }
  0x7d   : > { %1272 = vmatprep.mubr.msk.bf16.mxu0 %vm1396_vm0, %v1395_v1  ;;  %1324 = vmatprep.mubr.msk.bf16.mxu1 %vm1396_vm0, %v1395_v1 }
  0x84   : > { %1273 = vmatmul.mubr.bf16.gmra.mxu0 %v1384_v31  ;;  %1325 = vmatmul.mubr.bf16.gmra.mxu1 %v1385_v32 }
  0x85   : > { %1276 = vmatprep.mubr.msk.bf16.mxu0 %vm1396_vm0, %v1395_v1 }
  0x8c   : > { %1277 = vmatmul.mubr.bf16.gmra.mxu0 %v1386_v33 }
  0xec   : > { %v480_v35 = vpop.f32.mrf.mxu0  ;;  %v584_v36 = vpop.f32.mrf.mxu1 }
  0xed   : > { %v481_v37 = vadd.f32 %v1553_v34, %v480_v35  ;;  %v585_v38 = vadd.f32 %v1553_v34, %v584_v36 }
  0xee   : > { %v1230_v39 = vpop.f32.mrf.mxu0  ;;  %v1282_v40 = vpop.f32.mrf.mxu1 }
  0xef   : > { %v679_v41 = vmax.f32 %v481_v37, 0.0  ;;  %v705_v42 = vmax.f32 %v585_v38, 0.0 }
  0xf0   : > { %v483_v43 = vpop.f32.mrf.mxu0  ;;  %v587_v44 = vpop.f32.mrf.mxu1 }
  0xf1   : > { %v1129_v45 = vpack.c.bf16 %v679_v41, %v679_v41  ;;  %v1155_v46 = vpack.c.bf16 %v705_v42, %v705_v42  ;;  %v484_v47 = vadd.f32 %v1553_v34, %v483_v43  ;;  %v588_v48 = vadd.f32 %v1553_v34, %v587_v44 }
  0xf2   : > { %v1231_v49 = vpop.f32.mrf.mxu0  ;;  %v1283_v50 = vpop.f32.mrf.mxu1 }
  0xf3   : > { %930 = vst.msk [vmem:[%s1562_s13] sm:$0xf] %vm929_vm1, %v1129_v45  ;;  %956 = vst.msk [vmem:[%s1562_s13 + $0x68] sm:$0xf] %vm929_vm1, %v1155_v46  ;;  %v680_v51 = vmax.f32 %v484_v47, 0.0  ;;  %v706_v52 = vmax.f32 %v588_v48, 0.0 }
  0xf4   : > { %v488_v53 = vpop.f32.mrf.mxu0  ;;  %v592_v54 = vpop.f32.mrf.mxu1 }
  0xf5   : > { %v1130_v55 = vpack.c.bf16 %v680_v51, %v680_v51  ;;  %v1156_v56 = vpack.c.bf16 %v706_v52, %v706_v52  ;;  %v489_v57 = vadd.f32 %v1553_v34, %v488_v53  ;;  %v593_v58 = vadd.f32 %v1553_v34, %v592_v54 }
  0xf6   : > { %v1234_v59 = vpop.f32.mrf.mxu0  ;;  %v1286_v60 = vpop.f32.mrf.mxu1 }
  0xf7   : > { %931 = vst.msk [vmem:[%s1562_s13 + $0x4] sm:$0xf] %vm929_vm1, %v1130_v55  ;;  %957 = vst.msk [vmem:[%s1562_s13 + $0x6c] sm:$0xf] %vm929_vm1, %v1156_v56  ;;  %v681_v61 = vmax.f32 %v489_v57, 0.0  ;;  %v707_v62 = vmax.f32 %v593_v58, 0.0 }
  0xf8   : > { %v491_v63 = vpop.f32.mrf.mxu0  ;;  %v595_v0 = vpop.f32.mrf.mxu1 }
  0xf9   : > { %v1131_v1 = vpack.c.bf16 %v681_v61, %v681_v61  ;;  %v1157_v2 = vpack.c.bf16 %v707_v62, %v707_v62  ;;  %v492_v3 = vadd.f32 %v1553_v34, %v491_v63  ;;  %v596_v4 = vadd.f32 %v1553_v34, %v595_v0 }
  0xfa   : > { %v1235_v5 = vpop.f32.mrf.mxu0  ;;  %v1287_v6 = vpop.f32.mrf.mxu1 }
  0xfb   : > { %932 = vst.msk [vmem:[%s1562_s13 + $0x8] sm:$0xf] %vm929_vm1, %v1131_v1  ;;  %958 = vst.msk [vmem:[%s1562_s13 + $0x70] sm:$0xf] %vm929_vm1, %v1157_v2  ;;  %v682_v7 = vmax.f32 %v492_v3, 0.0  ;;  %v708_v8 = vmax.f32 %v596_v4, 0.0 }
  0xfc   : > { %v496_v9 = vpop.f32.mrf.mxu0  ;;  %v600_v10 = vpop.f32.mrf.mxu1 }
  0xfd   : > { %v1132_v11 = vpack.c.bf16 %v682_v7, %v682_v7  ;;  %v1158_v12 = vpack.c.bf16 %v708_v8, %v708_v8  ;;  %v497_v13 = vadd.f32 %v1553_v34, %v496_v9  ;;  %v601_v14 = vadd.f32 %v1553_v34, %v600_v10 }
  0xfe   : > { %v1238_v15 = vpop.f32.mrf.mxu0  ;;  %v1290_v16 = vpop.f32.mrf.mxu1 }
  0xff   : > { %933 = vst.msk [vmem:[%s1562_s13 + $0xc] sm:$0xf] %vm929_vm1, %v1132_v11  ;;  %959 = vst.msk [vmem:[%s1562_s13 + $0x74] sm:$0xf] %vm929_vm1, %v1158_v12  ;;  %v683_v17 = vmax.f32 %v497_v13, 0.0  ;;  %v709_v18 = vmax.f32 %v601_v14, 0.0 }
 0x100   : > { %v499_v19 = vpop.f32.mrf.mxu0  ;;  %v603_v20 = vpop.f32.mrf.mxu1 }
 0x101   : > { %v1133_v21 = vpack.c.bf16 %v683_v17, %v683_v17  ;;  %v1159_v22 = vpack.c.bf16 %v709_v18, %v709_v18  ;;  %v500_v23 = vadd.f32 %v1553_v34, %v499_v19  ;;  %v604_v24 = vadd.f32 %v1553_v34, %v603_v20 }
 0x102   : > { %v1239_v25 = vpop.f32.mrf.mxu0  ;;  %v1291_v26 = vpop.f32.mrf.mxu1 }
 0x103   : > { %934 = vst.msk [vmem:[%s1562_s13 + $0x10] sm:$0xf] %vm929_vm1, %v1133_v21  ;;  %960 = vst.msk [vmem:[%s1562_s13 + $0x78] sm:$0xf] %vm929_vm1, %v1159_v22  ;;  %v684_v27 = vmax.f32 %v500_v23, 0.0  ;;  %v710_v28 = vmax.f32 %v604_v24, 0.0 }
 0x104   : > { %v504_v29 = vpop.f32.mrf.mxu0  ;;  %v608_v30 = vpop.f32.mrf.mxu1 }
 0x105   : > { %v1134_v31 = vpack.c.bf16 %v684_v27, %v684_v27  ;;  %v1160_v32 = vpack.c.bf16 %v710_v28, %v710_v28  ;;  %v505_v33 = vadd.f32 %v1553_v34, %v504_v29  ;;  %v609_v35 = vadd.f32 %v1553_v34, %v608_v30 }
 0x106   : > { %v1242_v36 = vpop.f32.mrf.mxu0  ;;  %v1294_v37 = vpop.f32.mrf.mxu1 }
 0x107   : > { %935 = vst.msk [vmem:[%s1562_s13 + $0x14] sm:$0xf] %vm929_vm1, %v1134_v31  ;;  %961 = vst.msk [vmem:[%s1562_s13 + $0x7c] sm:$0xf] %vm929_vm1, %v1160_v32  ;;  %v685_v38 = vmax.f32 %v505_v33, 0.0  ;;  %v711_v39 = vmax.f32 %v609_v35, 0.0 }
 0x108   : > { %v507_v40 = vpop.f32.mrf.mxu0  ;;  %v611_v41 = vpop.f32.mrf.mxu1 }
 0x109   : > { %v1135_v42 = vpack.c.bf16 %v685_v38, %v685_v38  ;;  %v1161_v43 = vpack.c.bf16 %v711_v39, %v711_v39  ;;  %v508_v44 = vadd.f32 %v1553_v34, %v507_v40  ;;  %v612_v45 = vadd.f32 %v1553_v34, %v611_v41 }
 0x10a   : > { %v1243_v46 = vpop.f32.mrf.mxu0  ;;  %v1295_v47 = vpop.f32.mrf.mxu1 }
 0x10b   : > { %936 = vst.msk [vmem:[%s1562_s13 + $0x18] sm:$0xf] %vm929_vm1, %v1135_v42  ;;  %962 = vst.msk [vmem:[%s1562_s13 + $0x80] sm:$0xf] %vm929_vm1, %v1161_v43  ;;  %v686_v48 = vmax.f32 %v508_v44, 0.0  ;;  %v712_v49 = vmax.f32 %v612_v45, 0.0 }
 0x10c   : > { %v512_v50 = vpop.f32.mrf.mxu0  ;;  %v616_v51 = vpop.f32.mrf.mxu1 }
 0x10d   : > { %v1136_v52 = vpack.c.bf16 %v686_v48, %v686_v48  ;;  %v1162_v53 = vpack.c.bf16 %v712_v49, %v712_v49  ;;  %v513_v54 = vadd.f32 %v1553_v34, %v512_v50  ;;  %v617_v55 = vadd.f32 %v1553_v34, %v616_v51 }
 0x10e   : > { %v1246_v56 = vpop.f32.mrf.mxu0  ;;  %v1298_v57 = vpop.f32.mrf.mxu1 }
 0x10f   : > { %937 = vst.msk [vmem:[%s1562_s13 + $0x1c] sm:$0xf] %vm929_vm1, %v1136_v52  ;;  %963 = vst.msk [vmem:[%s1562_s13 + $0x84] sm:$0xf] %vm929_vm1, %v1162_v53  ;;  %v687_v58 = vmax.f32 %v513_v54, 0.0  ;;  %v713_v59 = vmax.f32 %v617_v55, 0.0 }
 0x110   : > { %v515_v60 = vpop.f32.mrf.mxu0  ;;  %v619_v61 = vpop.f32.mrf.mxu1 }
 0x111   : > { %v1137_v62 = vpack.c.bf16 %v687_v58, %v687_v58  ;;  %v1163_v63 = vpack.c.bf16 %v713_v59, %v713_v59  ;;  %v516_v0 = vadd.f32 %v1553_v34, %v515_v60  ;;  %v620_v1 = vadd.f32 %v1553_v34, %v619_v61 }
 0x112   : > { %v1247_v2 = vpop.f32.mrf.mxu0  ;;  %v1299_v3 = vpop.f32.mrf.mxu1 }
 0x113   : > { %938 = vst.msk [vmem:[%s1562_s13 + $0x20] sm:$0xf] %vm929_vm1, %v1137_v62  ;;  %964 = vst.msk [vmem:[%s1562_s13 + $0x88] sm:$0xf] %vm929_vm1, %v1163_v63  ;;  %v688_v4 = vmax.f32 %v516_v0, 0.0  ;;  %v714_v5 = vmax.f32 %v620_v1, 0.0 }
 0x114   : > { %v520_v6 = vpop.f32.mrf.mxu0  ;;  %v624_v7 = vpop.f32.mrf.mxu1 }
 0x115   : > { %v1138_v8 = vpack.c.bf16 %v688_v4, %v688_v4  ;;  %v1164_v9 = vpack.c.bf16 %v714_v5, %v714_v5  ;;  %v521_v10 = vadd.f32 %v1553_v34, %v520_v6  ;;  %v625_v11 = vadd.f32 %v1553_v34, %v624_v7 }
 0x116   : > { %v1250_v12 = vpop.f32.mrf.mxu0  ;;  %v1302_v13 = vpop.f32.mrf.mxu1 }
 0x117   : > { %939 = vst.msk [vmem:[%s1562_s13 + $0x24] sm:$0xf] %vm929_vm1, %v1138_v8  ;;  %965 = vst.msk [vmem:[%s1562_s13 + $0x8c] sm:$0xf] %vm929_vm1, %v1164_v9  ;;  %v689_v14 = vmax.f32 %v521_v10, 0.0  ;;  %v715_v15 = vmax.f32 %v625_v11, 0.0 }
 0x118   : > { %v523_v16 = vpop.f32.mrf.mxu0  ;;  %v627_v17 = vpop.f32.mrf.mxu1 }
 0x119   : > { %v1139_v18 = vpack.c.bf16 %v689_v14, %v689_v14  ;;  %v1165_v19 = vpack.c.bf16 %v715_v15, %v715_v15  ;;  %v524_v20 = vadd.f32 %v1553_v34, %v523_v16  ;;  %v628_v21 = vadd.f32 %v1553_v34, %v627_v17 }
 0x11a   : > { %v1251_v22 = vpop.f32.mrf.mxu0  ;;  %v1303_v23 = vpop.f32.mrf.mxu1 }
 0x11b   : > { %940 = vst.msk [vmem:[%s1562_s13 + $0x28] sm:$0xf] %vm929_vm1, %v1139_v18  ;;  %966 = vst.msk [vmem:[%s1562_s13 + $0x90] sm:$0xf] %vm929_vm1, %v1165_v19  ;;  %v690_v24 = vmax.f32 %v524_v20, 0.0  ;;  %v716_v25 = vmax.f32 %v628_v21, 0.0 }
 0x11c   : > { %v528_v26 = vpop.f32.mrf.mxu0  ;;  %v632_v27 = vpop.f32.mrf.mxu1 }
 0x11d   : > { %v1140_v28 = vpack.c.bf16 %v690_v24, %v690_v24  ;;  %v1166_v29 = vpack.c.bf16 %v716_v25, %v716_v25  ;;  %v529_v30 = vadd.f32 %v1553_v34, %v528_v26  ;;  %v633_v31 = vadd.f32 %v1553_v34, %v632_v27 }
 0x11e   : > { %v1254_v32 = vpop.f32.mrf.mxu0  ;;  %v1306_v33 = vpop.f32.mrf.mxu1 }
 0x11f   : > { %941 = vst.msk [vmem:[%s1562_s13 + $0x2c] sm:$0xf] %vm929_vm1, %v1140_v28  ;;  %967 = vst.msk [vmem:[%s1562_s13 + $0x94] sm:$0xf] %vm929_vm1, %v1166_v29  ;;  %v691_v35 = vmax.f32 %v529_v30, 0.0  ;;  %v717_v36 = vmax.f32 %v633_v31, 0.0 }
 0x120   : > { %v531_v37 = vpop.f32.mrf.mxu0  ;;  %v635_v38 = vpop.f32.mrf.mxu1 }
 0x121   : > { %v1141_v39 = vpack.c.bf16 %v691_v35, %v691_v35  ;;  %v1167_v40 = vpack.c.bf16 %v717_v36, %v717_v36  ;;  %v532_v41 = vadd.f32 %v1553_v34, %v531_v37  ;;  %v636_v42 = vadd.f32 %v1553_v34, %v635_v38 }
 0x122   : > { %v1255_v43 = vpop.f32.mrf.mxu0  ;;  %v1307_v44 = vpop.f32.mrf.mxu1 }
 0x123   : > { %942 = vst.msk [vmem:[%s1562_s13 + $0x30] sm:$0xf] %vm929_vm1, %v1141_v39  ;;  %968 = vst.msk [vmem:[%s1562_s13 + $0x98] sm:$0xf] %vm929_vm1, %v1167_v40  ;;  %v692_v45 = vmax.f32 %v532_v41, 0.0  ;;  %v718_v46 = vmax.f32 %v636_v42, 0.0 }
 0x124   : > { %v536_v47 = vpop.f32.mrf.mxu0  ;;  %v640_v48 = vpop.f32.mrf.mxu1 }
 0x125   : > { %v1142_v49 = vpack.c.bf16 %v692_v45, %v692_v45  ;;  %v1168_v50 = vpack.c.bf16 %v718_v46, %v718_v46  ;;  %v537_v51 = vadd.f32 %v1553_v34, %v536_v47  ;;  %v641_v52 = vadd.f32 %v1553_v34, %v640_v48 }
 0x126   : > { %v1258_v53 = vpop.f32.mrf.mxu0  ;;  %v1310_v54 = vpop.f32.mrf.mxu1 }
 0x127   : > { %943 = vst.msk [vmem:[%s1562_s13 + $0x34] sm:$0xf] %vm929_vm1, %v1142_v49  ;;  %969 = vst.msk [vmem:[%s1562_s13 + $0x9c] sm:$0xf] %vm929_vm1, %v1168_v50  ;;  %v693_v55 = vmax.f32 %v537_v51, 0.0  ;;  %v719_v56 = vmax.f32 %v641_v52, 0.0 }
 0x128   : > { %v539_v57 = vpop.f32.mrf.mxu0  ;;  %v643_v58 = vpop.f32.mrf.mxu1 }
 0x129   : > { %v1143_v59 = vpack.c.bf16 %v693_v55, %v693_v55  ;;  %v1169_v60 = vpack.c.bf16 %v719_v56, %v719_v56  ;;  %v540_v61 = vadd.f32 %v1553_v34, %v539_v57  ;;  %v644_v62 = vadd.f32 %v1553_v34, %v643_v58 }
 0x12a   : > { %v1259_v63 = vpop.f32.mrf.mxu0  ;;  %v1311_v0 = vpop.f32.mrf.mxu1 }
 0x12b   : > { %944 = vst.msk [vmem:[%s1562_s13 + $0x38] sm:$0xf] %vm929_vm1, %v1143_v59  ;;  %970 = vst.msk [vmem:[%s1562_s13 + $0xa0] sm:$0xf] %vm929_vm1, %v1169_v60  ;;  %v694_v1 = vmax.f32 %v540_v61, 0.0  ;;  %v720_v2 = vmax.f32 %v644_v62, 0.0 }
 0x12c   : > { %v544_v3 = vpop.f32.mrf.mxu0  ;;  %v648_v4 = vpop.f32.mrf.mxu1 }
 0x12d   : > { %v1144_v5 = vpack.c.bf16 %v694_v1, %v694_v1  ;;  %v1170_v6 = vpack.c.bf16 %v720_v2, %v720_v2  ;;  %v545_v7 = vadd.f32 %v1553_v34, %v544_v3  ;;  %v649_v8 = vadd.f32 %v1553_v34, %v648_v4 }
 0x12e   : > { %v1262_v9 = vpop.f32.mrf.mxu0  ;;  %v1314_v10 = vpop.f32.mrf.mxu1 }
 0x12f   : > { %945 = vst.msk [vmem:[%s1562_s13 + $0x3c] sm:$0xf] %vm929_vm1, %v1144_v5  ;;  %971 = vst.msk [vmem:[%s1562_s13 + $0xa4] sm:$0xf] %vm929_vm1, %v1170_v6  ;;  %v695_v11 = vmax.f32 %v545_v7, 0.0  ;;  %v721_v12 = vmax.f32 %v649_v8, 0.0 }
 0x130   : > { %v547_v13 = vpop.f32.mrf.mxu0  ;;  %v651_v14 = vpop.f32.mrf.mxu1 }
 0x131   : > { %v1145_v15 = vpack.c.bf16 %v695_v11, %v695_v11  ;;  %v1171_v16 = vpack.c.bf16 %v721_v12, %v721_v12  ;;  %v548_v17 = vadd.f32 %v1553_v34, %v547_v13  ;;  %v652_v18 = vadd.f32 %v1553_v34, %v651_v14 }
 0x132   : > { %v1263_v19 = vpop.f32.mrf.mxu0  ;;  %v1315_v20 = vpop.f32.mrf.mxu1 }
 0x133   : > { %946 = vst.msk [vmem:[%s1562_s13 + $0x40] sm:$0xf] %vm929_vm1, %v1145_v15  ;;  %972 = vst.msk [vmem:[%s1562_s13 + $0xa8] sm:$0xf] %vm929_vm1, %v1171_v16  ;;  %v696_v21 = vmax.f32 %v548_v17, 0.0  ;;  %v722_v22 = vmax.f32 %v652_v18, 0.0 }
 0x134   : > { %v552_v23 = vpop.f32.mrf.mxu0  ;;  %v656_v24 = vpop.f32.mrf.mxu1 }
 0x135   : > { %v1146_v25 = vpack.c.bf16 %v696_v21, %v696_v21  ;;  %v1172_v26 = vpack.c.bf16 %v722_v22, %v722_v22  ;;  %v553_v27 = vadd.f32 %v1553_v34, %v552_v23  ;;  %v657_v28 = vadd.f32 %v1553_v34, %v656_v24 }
 0x136   : > { %v1266_v29 = vpop.f32.mrf.mxu0  ;;  %v1318_v30 = vpop.f32.mrf.mxu1 }
 0x137   : > { %947 = vst.msk [vmem:[%s1562_s13 + $0x44] sm:$0xf] %vm929_vm1, %v1146_v25  ;;  %973 = vst.msk [vmem:[%s1562_s13 + $0xac] sm:$0xf] %vm929_vm1, %v1172_v26  ;;  %v697_v31 = vmax.f32 %v553_v27, 0.0  ;;  %v723_v32 = vmax.f32 %v657_v28, 0.0 }
 0x138   : > { %v555_v33 = vpop.f32.mrf.mxu0  ;;  %v659_v35 = vpop.f32.mrf.mxu1 }
 0x139   : > { %v1147_v36 = vpack.c.bf16 %v697_v31, %v697_v31  ;;  %v1173_v37 = vpack.c.bf16 %v723_v32, %v723_v32  ;;  %v556_v38 = vadd.f32 %v1553_v34, %v555_v33  ;;  %v660_v39 = vadd.f32 %v1553_v34, %v659_v35 }
 0x13a   : > { %v1267_v40 = vpop.f32.mrf.mxu0  ;;  %v1319_v41 = vpop.f32.mrf.mxu1 }
 0x13b   : > { %948 = vst.msk [vmem:[%s1562_s13 + $0x48] sm:$0xf] %vm929_vm1, %v1147_v36  ;;  %974 = vst.msk [vmem:[%s1562_s13 + $0xb0] sm:$0xf] %vm929_vm1, %v1173_v37  ;;  %v698_v42 = vmax.f32 %v556_v38, 0.0  ;;  %v724_v43 = vmax.f32 %v660_v39, 0.0 }
 0x13c   : > { %v560_v44 = vpop.f32.mrf.mxu0  ;;  %v664_v45 = vpop.f32.mrf.mxu1 }
 0x13d   : > { %v1148_v46 = vpack.c.bf16 %v698_v42, %v698_v42  ;;  %v1174_v47 = vpack.c.bf16 %v724_v43, %v724_v43  ;;  %v561_v48 = vadd.f32 %v1553_v34, %v560_v44  ;;  %v665_v49 = vadd.f32 %v1553_v34, %v664_v45 }
 0x13e   : > { %v1270_v50 = vpop.f32.mrf.mxu0  ;;  %v1322_v51 = vpop.f32.mrf.mxu1 }
 0x13f   : > { %949 = vst.msk [vmem:[%s1562_s13 + $0x4c] sm:$0xf] %vm929_vm1, %v1148_v46  ;;  %975 = vst.msk [vmem:[%s1562_s13 + $0xb4] sm:$0xf] %vm929_vm1, %v1174_v47  ;;  %v699_v52 = vmax.f32 %v561_v48, 0.0  ;;  %v725_v53 = vmax.f32 %v665_v49, 0.0 }
 0x140   : > { %v563_v54 = vpop.f32.mrf.mxu0  ;;  %v667_v55 = vpop.f32.mrf.mxu1 }
 0x141   : > { %v1149_v56 = vpack.c.bf16 %v699_v52, %v699_v52  ;;  %v1175_v57 = vpack.c.bf16 %v725_v53, %v725_v53  ;;  %v564_v58 = vadd.f32 %v1553_v34, %v563_v54  ;;  %v668_v59 = vadd.f32 %v1553_v34, %v667_v55 }
 0x142   : > { %v1271_v60 = vpop.f32.mrf.mxu0  ;;  %v1323_v61 = vpop.f32.mrf.mxu1 }
 0x143   : > { %950 = vst.msk [vmem:[%s1562_s13 + $0x50] sm:$0xf] %vm929_vm1, %v1149_v56  ;;  %976 = vst.msk [vmem:[%s1562_s13 + $0xb8] sm:$0xf] %vm929_vm1, %v1175_v57  ;;  %v700_v62 = vmax.f32 %v564_v58, 0.0  ;;  %v726_v63 = vmax.f32 %v668_v59, 0.0 }
 0x144   : > { %v568_v0 = vpop.f32.mrf.mxu0  ;;  %v672_v1 = vpop.f32.mrf.mxu1 }
 0x145   : > { %v1150_v2 = vpack.c.bf16 %v700_v62, %v700_v62  ;;  %v1176_v3 = vpack.c.bf16 %v726_v63, %v726_v63  ;;  %v569_v4 = vadd.f32 %v1553_v34, %v568_v0  ;;  %v673_v5 = vadd.f32 %v1553_v34, %v672_v1 }
 0x146   : > { %v1274_v6 = vpop.f32.mrf.mxu0  ;;  %v1326_v7 = vpop.f32.mrf.mxu1 }
 0x147   : > { %951 = vst.msk [vmem:[%s1562_s13 + $0x54] sm:$0xf] %vm929_vm1, %v1150_v2  ;;  %977 = vst.msk [vmem:[%s1562_s13 + $0xbc] sm:$0xf] %vm929_vm1, %v1176_v3  ;;  %v701_v8 = vmax.f32 %v569_v4, 0.0  ;;  %v727_v9 = vmax.f32 %v673_v5, 0.0 }
 0x148   : > { %v571_v10 = vpop.f32.mrf.mxu0  ;;  %v675_v11 = vpop.f32.mrf.mxu1 }
 0x149   : > { %v1151_v12 = vpack.c.bf16 %v701_v8, %v701_v8  ;;  %v1177_v13 = vpack.c.bf16 %v727_v9, %v727_v9  ;;  %v572_v14 = vadd.f32 %v1553_v34, %v571_v10  ;;  %v676_v15 = vadd.f32 %v1553_v34, %v675_v11 }
 0x14a   : > { %v1275_v16 = vpop.f32.mrf.mxu0  ;;  %v1327_v17 = vpop.f32.mrf.mxu1 }
 0x14b   : > { %952 = vst.msk [vmem:[%s1562_s13 + $0x58] sm:$0xf] %vm929_vm1, %v1151_v12  ;;  %978 = vst.msk [vmem:[%s1562_s13 + $0xc0] sm:$0xf] %vm929_vm1, %v1177_v13  ;;  %v702_v18 = vmax.f32 %v572_v14, 0.0  ;;  %v728_v19 = vmax.f32 %v676_v15, 0.0 }
 0x14c   : > { %v576_v20 = vpop.f32.mrf.mxu0 }
 0x14d   : > { %v1152_v21 = vpack.c.bf16 %v702_v18, %v702_v18  ;;  %v1178_v22 = vpack.c.bf16 %v728_v19, %v728_v19  ;;  %v577_v23 = vadd.f32 %v1553_v34, %v576_v20 }
 0x14e   : > { %v1278_v24 = vpop.f32.mrf.mxu0 }
 0x14f   : > { %953 = vst.msk [vmem:[%s1562_s13 + $0x5c] sm:$0xf] %vm929_vm1, %v1152_v21  ;;  %979 = vst.msk [vmem:[%s1562_s13 + $0xc4] sm:$0xf] %vm929_vm1, %v1178_v22  ;;  %v703_v25 = vmax.f32 %v577_v23, 0.0 }
 0x150   : > { %v579_v26 = vpop.f32.mrf.mxu0 }
 0x151   : > { %v1153_v27 = vpack.c.bf16 %v703_v25, %v703_v25  ;;  %v580_v28 = vadd.f32 %v1553_v34, %v579_v26 }
 0x152   : > { %v1279_v29 = vpop.f32.mrf.mxu0 }
 0x153   : > { %954 = vst.msk [vmem:[%s1562_s13 + $0x60] sm:$0xf] %vm929_vm1, %v1153_v27  ;;  %v704_v30 = vmax.f32 %v580_v28, 0.0 }
 0x155   : > { %v1154_v31 = vpack.c.bf16 %v704_v30, %v704_v30 }
 0x157   : > { %955 = vst.msk [vmem:[%s1562_s13 + $0x64] sm:$0xf] %vm929_vm1, %v1154_v31 }
 0x158 PF: > { %s13_s12 = sadd.s32 1, %s1393_s12  }
 0x159   : > { %p10_p4 = scmp.ge.s32.totalorder %s13_s12, 5  }
 0x15b   :  { %12 = sbr.rel (!%p10_p4) target bundleno = 1 (0x1), region = 62 }

// kernel: encoder_forward.6
= control target key start
LH: loop header
LB: loop body
LE: loop exit
PB: predicated region body
PF: predicated region fallthrough
CT: control target
= control target key end

     0   :  { %vm603_vm0 = vcmask 257024   ;;  %s1208_s1 = inlined_call_operand.vmem [shape: bf16[256,32], index: 1, kind: input, shape index: {}]   ;;  %s1209_s0 = inlined_call_operand.vmem [shape: bf16[224,256], index: 0, kind: input, shape index: {}]   ;;  %s1210_s2 = inlined_call_operand.vmem [shape: f32[1,32], index: 2, kind: input, shape index: {}]   ;;  %s1211_s3 = inlined_call_operand.vmem [shape: bf16[224,32], index: 3, kind: output, shape index: {}]  }
   0x1   :  { %v853_v0 = vld [vmem:[%s1208_s1 + $0x78] sm:$0xff]   ;;  %v855_v2 = vld [vmem:[%s1208_s1 + $0x70] sm:$0xff]   ;;  %v857_v4 = vld [vmem:[%s1208_s1 + $0x68] sm:$0xff]  }
   0x2   :  { %v854_v1 = vld [vmem:[%s1208_s1 + $0x38] sm:$0xff]   ;;  %737 = vmatprep.subr.bf16.mxu0 %v853_v0  ;;  %837 = vmatprep.subr.bf16.mxu1 %v853_v0  ;;  %v856_v3 = vld [vmem:[%s1208_s1 + $0x30] sm:$0xff]   ;;  %v858_v5 = vld [vmem:[%s1208_s1 + $0x28] sm:$0xff]  }
   0x3   :  { %738 = vmatpush3.bf16.msra.mxu0 %v854_v1  ;;  %845 = vmatpush3.bf16.msra.mxu1 %v854_v1  ;;  %v859_v6 = vld [vmem:[%s1208_s1 + $0x60] sm:$0xff]   ;;  %v861_v8 = vld [vmem:[%s1208_s1 + $0x58] sm:$0xff]   ;;  %v863_v10 = vld [vmem:[%s1208_s1 + $0x50] sm:$0xff]  }
   0x4   :  { %739 = vmatprep.subr.bf16.mxu0 %v855_v2  ;;  %838 = vmatprep.subr.bf16.mxu1 %v855_v2  ;;  %v860_v7 = vld [vmem:[%s1208_s1 + $0x20] sm:$0xff]   ;;  %v862_v9 = vld [vmem:[%s1208_s1 + $0x18] sm:$0xff]   ;;  %v864_v13 = vld [vmem:[%s1208_s1 + $0x10] sm:$0xff]  }
   0x5   :  { %v871_v11 = vld [vmem:[%s1209_s0 + $0x4] ss:$8 sps:$4 sm:$0xff]   ;;  %v874_v12 = vld [vmem:[%s1209_s0 + $0x74] ss:$8 sps:$4 sm:$0xff]   ;;  %v869_v18 = vld [vmem:[%s1209_s0] ss:$8 sps:$4 sm:$0xff]  }
   0x6   :  { %v865_v14 = vld [vmem:[%s1208_s1 + $0x48] sm:$0xff]   ;;  %350 = vmatprep.mubr.bf16.mxu0 %v871_v11  ;;  %406 = vmatprep.mubr.bf16.mxu1 %v874_v12  ;;  %v867_v16 = vld [vmem:[%s1208_s1 + $0x40] sm:$0xff]   ;;  %v872_v19 = vld [vmem:[%s1209_s0 + $0x70] ss:$8 sps:$4 sm:$0xff]  }
   0x7   :  { %740 = vmatpush3.bf16.msra.mxu0 %v856_v3  ;;  %846 = vmatpush3.bf16.msra.mxu1 %v856_v3  ;;  %v866_v15 = vld [vmem:[%s1208_s1 + $0x8] sm:$0xff]   ;;  %v868_v17 = vld [vmem:[%s1208_s1] sm:$0xff]   ;;  %v875_v20 = vld [vmem:[%s1209_s0 + $0x14] ss:$8 sps:$4 sm:$0xff]  }
   0x8   :  { %741 = vmatprep.subr.bf16.mxu0 %v857_v4  ;;  %839 = vmatprep.subr.bf16.mxu1 %v857_v4  ;;  %v877_v21 = vld [vmem:[%s1209_s0 + $0x84] ss:$8 sps:$4 sm:$0xff]   ;;  %v879_v22 = vld [vmem:[%s1209_s0 + $0x10] ss:$8 sps:$4 sm:$0xff]   ;;  %v880_v23 = vld [vmem:[%s1209_s0 + $0x80] ss:$8 sps:$4 sm:$0xff]  }
   0x9   :  { %v881_v24 = vld [vmem:[%s1209_s0 + $0x24] ss:$8 sps:$4 sm:$0xff]   ;;  %v883_v25 = vld [vmem:[%s1209_s0 + $0x94] ss:$8 sps:$4 sm:$0xff]   ;;  %v885_v26 = vld [vmem:[%s1209_s0 + $0x20] ss:$8 sps:$4 sm:$0xff]  }
   0xa   :  { %v886_v27 = vld [vmem:[%s1209_s0 + $0x90] ss:$8 sps:$4 sm:$0xff]   ;;  %v887_v28 = vld [vmem:[%s1209_s0 + $0x34] ss:$8 sps:$4 sm:$0xff]   ;;  %v889_v29 = vld [vmem:[%s1209_s0 + $0xa4] ss:$8 sps:$4 sm:$0xff]  }
   0xb   :  { %742 = vmatpush3.bf16.msra.mxu0 %v858_v5  ;;  %847 = vmatpush3.bf16.msra.mxu1 %v858_v5  ;;  %v891_v30 = vld [vmem:[%s1209_s0 + $0x30] ss:$8 sps:$4 sm:$0xff]   ;;  %v892_v31 = vld [vmem:[%s1209_s0 + $0xa0] ss:$8 sps:$4 sm:$0xff]   ;;  %v893_v32 = vld [vmem:[%s1209_s0 + $0x44] ss:$8 sps:$4 sm:$0xff]  }
   0xc   :  { %743 = vmatprep.subr.bf16.mxu0 %v859_v6  ;;  %840 = vmatprep.subr.bf16.mxu1 %v859_v6  ;;  %v895_v33 = vld [vmem:[%s1209_s0 + $0xb4] ss:$8 sps:$4 sm:$0xff]   ;;  %v897_v34 = vld [vmem:[%s1209_s0 + $0x40] ss:$8 sps:$4 sm:$0xff]   ;;  %v898_v35 = vld [vmem:[%s1209_s0 + $0xb0] ss:$8 sps:$4 sm:$0xff]  }
   0xd   :  { %v899_v36 = vld [vmem:[%s1209_s0 + $0x54] ss:$8 sps:$4 sm:$0xff]   ;;  %v901_v37 = vld [vmem:[%s1209_s0 + $0xc4] ss:$8 sps:$4 sm:$0xff]   ;;  %v903_v38 = vld [vmem:[%s1209_s0 + $0x50] ss:$8 sps:$4 sm:$0xff]  }
   0xe   :  { %v904_v39 = vld [vmem:[%s1209_s0 + $0xc0] ss:$8 sps:$4 sm:$0xff]   ;;  %v905_v40 = vld [vmem:[%s1209_s0 + $0x64] ss:$8 sps:$4 sm:$0xff]   ;;  %v907_v41 = vld [vmem:[%s1209_s0 + $0xd4] ss:$8 sps:$4 sm:$0xff]  }
   0xf   :  { %744 = vmatpush3.bf16.msra.mxu0 %v860_v7  ;;  %848 = vmatpush3.bf16.msra.mxu1 %v860_v7  ;;  %v909_v42 = vld [vmem:[%s1209_s0 + $0x60] ss:$8 sps:$4 sm:$0xff]   ;;  %v910_v43 = vld [vmem:[%s1209_s0 + $0xd0] ss:$8 sps:$4 sm:$0xff]  }
  0x10   :  { %745 = vmatprep.subr.bf16.mxu0 %v861_v8  ;;  %841 = vmatprep.subr.bf16.mxu1 %v861_v8  ;;  %v1066_v46 = vld [vmem:[%s1210_s2] ss:$0 sm:$0xff] }
  0x13   :  { %746 = vmatpush3.bf16.msra.mxu0 %v862_v9  ;;  %849 = vmatpush3.bf16.msra.mxu1 %v862_v9 }
  0x14   :  { %747 = vmatprep.subr.bf16.mxu0 %v863_v10  ;;  %842 = vmatprep.subr.bf16.mxu1 %v863_v10 }
  0x17   :  { %748 = vmatpush3.bf16.msra.mxu0 %v864_v13  ;;  %850 = vmatpush3.bf16.msra.mxu1 %v864_v13 }
  0x18   :  { %749 = vmatprep.subr.bf16.mxu0 %v865_v14  ;;  %843 = vmatprep.subr.bf16.mxu1 %v865_v14 }
  0x1b   :  { %750 = vmatpush3.bf16.msra.mxu0 %v866_v15  ;;  %851 = vmatpush3.bf16.msra.mxu1 %v866_v15 }
  0x1c   :  { %751 = vmatprep.subr.bf16.mxu0 %v867_v16  ;;  %844 = vmatprep.subr.bf16.mxu1 %v867_v16 }
  0x1f   :  { %752 = vmatpush3.bf16.msra.mxu0 %v868_v17  ;;  %852 = vmatpush3.bf16.msra.mxu1 %v868_v17 }
  0x22   :  { %351 = vmatmul.mubr.bf16.vlgmr.msra.gmra.mxu0 %v869_v18  ;;  %407 = vmatmul.mubr.bf16.vlgmr.msra.gmra.mxu1 %v872_v19 }
  0x23   :  { %358 = vmatprep.mubr.bf16.mxu0 %v875_v20  ;;  %414 = vmatprep.mubr.bf16.mxu1 %v877_v21 }
  0x2a   :  { %359 = vmatmul.mubr.bf16.gmra.mxu0 %v879_v22  ;;  %415 = vmatmul.mubr.bf16.gmra.mxu1 %v880_v23 }
  0x2b   :  { %366 = vmatprep.mubr.bf16.mxu0 %v881_v24  ;;  %422 = vmatprep.mubr.bf16.mxu1 %v883_v25 }
  0x32   :  { %367 = vmatmul.mubr.bf16.gmra.mxu0 %v885_v26  ;;  %423 = vmatmul.mubr.bf16.gmra.mxu1 %v886_v27 }
  0x33   :  { %374 = vmatprep.mubr.bf16.mxu0 %v887_v28  ;;  %430 = vmatprep.mubr.bf16.mxu1 %v889_v29 }
  0x3a   :  { %375 = vmatmul.mubr.bf16.gmra.mxu0 %v891_v30  ;;  %431 = vmatmul.mubr.bf16.gmra.mxu1 %v892_v31 }
  0x3b   :  { %382 = vmatprep.mubr.bf16.mxu0 %v893_v32  ;;  %438 = vmatprep.mubr.bf16.mxu1 %v895_v33 }
  0x42   :  { %383 = vmatmul.mubr.bf16.gmra.mxu0 %v897_v34  ;;  %439 = vmatmul.mubr.bf16.gmra.mxu1 %v898_v35 }
  0x43   :  { %390 = vmatprep.mubr.bf16.mxu0 %v899_v36  ;;  %446 = vmatprep.mubr.bf16.mxu1 %v901_v37 }
  0x4a   :  { %391 = vmatmul.mubr.bf16.gmra.mxu0 %v903_v38  ;;  %447 = vmatmul.mubr.bf16.gmra.mxu1 %v904_v39 }
  0x4b   :  { %398 = vmatprep.mubr.bf16.mxu0 %v905_v40  ;;  %454 = vmatprep.mubr.bf16.mxu1 %v907_v41 }
  0x52   :  { %399 = vmatmul.mubr.bf16.gmra.mxu0 %v909_v42  ;;  %455 = vmatmul.mubr.bf16.gmra.mxu1 %v910_v43 }
  0xe2   :  { %v753_v44 = vpop.f32.mrf.mxu0  ;;  %v795_v45 = vpop.f32.mrf.mxu1 }
  0xe4   :  { %v754_v47 = vpop.f32.mrf.mxu0  ;;  %v796_v48 = vpop.f32.mrf.mxu1 }
  0xe5   :  { %v755_v49 = vadd.f32 %v754_v47, %v753_v44  ;;  %v797_v50 = vadd.f32 %v796_v48, %v795_v45 }
  0xe6   :  { %v756_v51 = vpop.f32.mrf.mxu0  ;;  %v798_v52 = vpop.f32.mrf.mxu1 }
  0xe7   :  { %v353_v53 = vadd.f32 %v755_v49, %v1066_v46  ;;  %v409_v54 = vadd.f32 %v797_v50, %v1066_v46 }
  0xe8   :  { %v757_v55 = vpop.f32.mrf.mxu0  ;;  %v799_v56 = vpop.f32.mrf.mxu1 }
  0xe9   :  { %v463_v57 = vmax.f32 %v353_v53, 0.0  ;;  %v477_v58 = vmax.f32 %v409_v54, 0.0  ;;  %v758_v59 = vadd.f32 %v757_v55, %v756_v51  ;;  %v800_v60 = vadd.f32 %v799_v56, %v798_v52 }
  0xea   :  { %v759_v61 = vpop.f32.mrf.mxu0  ;;  %v801_v62 = vpop.f32.mrf.mxu1 }
  0xeb   :  { %v709_v63 = vpack.c.bf16 %v463_v57, %v463_v57  ;;  %v723_v0 = vpack.c.bf16 %v477_v58, %v477_v58  ;;  %v356_v1 = vadd.f32 %v758_v59, %v1066_v46  ;;  %v412_v2 = vadd.f32 %v800_v60, %v1066_v46 }
  0xec   :  { %v760_v3 = vpop.f32.mrf.mxu0  ;;  %v802_v4 = vpop.f32.mrf.mxu1 }
  0xed   :  { %604 = vst.msk [vmem:[%s1211_s3] sm:$0xf] %vm603_vm0, %v709_v63  ;;  %618 = vst.msk [vmem:[%s1211_s3 + $0x38] sm:$0xf] %vm603_vm0, %v723_v0  ;;  %v464_v5 = vmax.f32 %v356_v1, 0.0  ;;  %v478_v6 = vmax.f32 %v412_v2, 0.0  ;;  %v761_v7 = vadd.f32 %v760_v3, %v759_v61  ;;  %v803_v8 = vadd.f32 %v802_v4, %v801_v62 }
  0xee   :  { %v762_v9 = vpop.f32.mrf.mxu0  ;;  %v804_v10 = vpop.f32.mrf.mxu1 }
  0xef   :  { %v710_v11 = vpack.c.bf16 %v464_v5, %v464_v5  ;;  %v724_v12 = vpack.c.bf16 %v478_v6, %v478_v6  ;;  %v361_v13 = vadd.f32 %v761_v7, %v1066_v46  ;;  %v417_v14 = vadd.f32 %v803_v8, %v1066_v46 }
  0xf0   :  { %v763_v15 = vpop.f32.mrf.mxu0  ;;  %v805_v16 = vpop.f32.mrf.mxu1 }
  0xf1   :  { %605 = vst.msk [vmem:[%s1211_s3 + $0x4] sm:$0xf] %vm603_vm0, %v710_v11  ;;  %619 = vst.msk [vmem:[%s1211_s3 + $0x3c] sm:$0xf] %vm603_vm0, %v724_v12  ;;  %v465_v17 = vmax.f32 %v361_v13, 0.0  ;;  %v479_v18 = vmax.f32 %v417_v14, 0.0  ;;  %v764_v19 = vadd.f32 %v763_v15, %v762_v9  ;;  %v806_v20 = vadd.f32 %v805_v16, %v804_v10 }
  0xf2   :  { %v765_v21 = vpop.f32.mrf.mxu0  ;;  %v807_v22 = vpop.f32.mrf.mxu1 }
  0xf3   :  { %v711_v23 = vpack.c.bf16 %v465_v17, %v465_v17  ;;  %v725_v24 = vpack.c.bf16 %v479_v18, %v479_v18  ;;  %v364_v25 = vadd.f32 %v764_v19, %v1066_v46  ;;  %v420_v26 = vadd.f32 %v806_v20, %v1066_v46 }
  0xf4   :  { %v766_v27 = vpop.f32.mrf.mxu0  ;;  %v808_v28 = vpop.f32.mrf.mxu1 }
  0xf5   :  { %606 = vst.msk [vmem:[%s1211_s3 + $0x8] sm:$0xf] %vm603_vm0, %v711_v23  ;;  %620 = vst.msk [vmem:[%s1211_s3 + $0x40] sm:$0xf] %vm603_vm0, %v725_v24  ;;  %v466_v29 = vmax.f32 %v364_v25, 0.0  ;;  %v480_v30 = vmax.f32 %v420_v26, 0.0  ;;  %v767_v31 = vadd.f32 %v766_v27, %v765_v21  ;;  %v809_v32 = vadd.f32 %v808_v28, %v807_v22 }
  0xf6   :  { %v768_v33 = vpop.f32.mrf.mxu0  ;;  %v810_v34 = vpop.f32.mrf.mxu1 }
  0xf7   :  { %v712_v35 = vpack.c.bf16 %v466_v29, %v466_v29  ;;  %v726_v36 = vpack.c.bf16 %v480_v30, %v480_v30  ;;  %v369_v37 = vadd.f32 %v767_v31, %v1066_v46  ;;  %v425_v38 = vadd.f32 %v809_v32, %v1066_v46 }
  0xf8   :  { %v769_v39 = vpop.f32.mrf.mxu0  ;;  %v811_v40 = vpop.f32.mrf.mxu1 }
  0xf9   :  { %607 = vst.msk [vmem:[%s1211_s3 + $0xc] sm:$0xf] %vm603_vm0, %v712_v35  ;;  %621 = vst.msk [vmem:[%s1211_s3 + $0x44] sm:$0xf] %vm603_vm0, %v726_v36  ;;  %v467_v41 = vmax.f32 %v369_v37, 0.0  ;;  %v481_v42 = vmax.f32 %v425_v38, 0.0  ;;  %v770_v43 = vadd.f32 %v769_v39, %v768_v33  ;;  %v812_v44 = vadd.f32 %v811_v40, %v810_v34 }
  0xfa   :  { %v771_v45 = vpop.f32.mrf.mxu0  ;;  %v813_v47 = vpop.f32.mrf.mxu1 }
  0xfb   :  { %v713_v48 = vpack.c.bf16 %v467_v41, %v467_v41  ;;  %v727_v49 = vpack.c.bf16 %v481_v42, %v481_v42  ;;  %v372_v50 = vadd.f32 %v770_v43, %v1066_v46  ;;  %v428_v51 = vadd.f32 %v812_v44, %v1066_v46 }
  0xfc   :  { %v772_v52 = vpop.f32.mrf.mxu0  ;;  %v814_v53 = vpop.f32.mrf.mxu1 }
  0xfd   :  { %608 = vst.msk [vmem:[%s1211_s3 + $0x10] sm:$0xf] %vm603_vm0, %v713_v48  ;;  %622 = vst.msk [vmem:[%s1211_s3 + $0x48] sm:$0xf] %vm603_vm0, %v727_v49  ;;  %v468_v54 = vmax.f32 %v372_v50, 0.0  ;;  %v482_v55 = vmax.f32 %v428_v51, 0.0  ;;  %v773_v56 = vadd.f32 %v772_v52, %v771_v45  ;;  %v815_v57 = vadd.f32 %v814_v53, %v813_v47 }
  0xfe   :  { %v774_v58 = vpop.f32.mrf.mxu0  ;;  %v816_v59 = vpop.f32.mrf.mxu1 }
  0xff   :  { %v714_v60 = vpack.c.bf16 %v468_v54, %v468_v54  ;;  %v728_v61 = vpack.c.bf16 %v482_v55, %v482_v55  ;;  %v377_v62 = vadd.f32 %v773_v56, %v1066_v46  ;;  %v433_v63 = vadd.f32 %v815_v57, %v1066_v46 }
 0x100   :  { %v775_v0 = vpop.f32.mrf.mxu0  ;;  %v817_v1 = vpop.f32.mrf.mxu1 }
 0x101   :  { %609 = vst.msk [vmem:[%s1211_s3 + $0x14] sm:$0xf] %vm603_vm0, %v714_v60  ;;  %623 = vst.msk [vmem:[%s1211_s3 + $0x4c] sm:$0xf] %vm603_vm0, %v728_v61  ;;  %v469_v2 = vmax.f32 %v377_v62, 0.0  ;;  %v483_v3 = vmax.f32 %v433_v63, 0.0  ;;  %v776_v4 = vadd.f32 %v775_v0, %v774_v58  ;;  %v818_v5 = vadd.f32 %v817_v1, %v816_v59 }
 0x102   :  { %v777_v6 = vpop.f32.mrf.mxu0  ;;  %v819_v7 = vpop.f32.mrf.mxu1 }
 0x103   :  { %v715_v8 = vpack.c.bf16 %v469_v2, %v469_v2  ;;  %v729_v9 = vpack.c.bf16 %v483_v3, %v483_v3  ;;  %v380_v10 = vadd.f32 %v776_v4, %v1066_v46  ;;  %v436_v11 = vadd.f32 %v818_v5, %v1066_v46 }
 0x104   :  { %v778_v12 = vpop.f32.mrf.mxu0  ;;  %v820_v13 = vpop.f32.mrf.mxu1 }
 0x105   :  { %610 = vst.msk [vmem:[%s1211_s3 + $0x18] sm:$0xf] %vm603_vm0, %v715_v8  ;;  %624 = vst.msk [vmem:[%s1211_s3 + $0x50] sm:$0xf] %vm603_vm0, %v729_v9  ;;  %v470_v14 = vmax.f32 %v380_v10, 0.0  ;;  %v484_v15 = vmax.f32 %v436_v11, 0.0  ;;  %v779_v16 = vadd.f32 %v778_v12, %v777_v6  ;;  %v821_v17 = vadd.f32 %v820_v13, %v819_v7 }
 0x106   :  { %v780_v18 = vpop.f32.mrf.mxu0  ;;  %v822_v19 = vpop.f32.mrf.mxu1 }
 0x107   :  { %v716_v20 = vpack.c.bf16 %v470_v14, %v470_v14  ;;  %v730_v21 = vpack.c.bf16 %v484_v15, %v484_v15  ;;  %v385_v22 = vadd.f32 %v779_v16, %v1066_v46  ;;  %v441_v23 = vadd.f32 %v821_v17, %v1066_v46 }
 0x108   :  { %v781_v24 = vpop.f32.mrf.mxu0  ;;  %v823_v25 = vpop.f32.mrf.mxu1 }
 0x109   :  { %611 = vst.msk [vmem:[%s1211_s3 + $0x1c] sm:$0xf] %vm603_vm0, %v716_v20  ;;  %625 = vst.msk [vmem:[%s1211_s3 + $0x54] sm:$0xf] %vm603_vm0, %v730_v21  ;;  %v471_v26 = vmax.f32 %v385_v22, 0.0  ;;  %v485_v27 = vmax.f32 %v441_v23, 0.0  ;;  %v782_v28 = vadd.f32 %v781_v24, %v780_v18  ;;  %v824_v29 = vadd.f32 %v823_v25, %v822_v19 }
 0x10a   :  { %v783_v30 = vpop.f32.mrf.mxu0  ;;  %v825_v31 = vpop.f32.mrf.mxu1 }
 0x10b   :  { %v717_v32 = vpack.c.bf16 %v471_v26, %v471_v26  ;;  %v731_v33 = vpack.c.bf16 %v485_v27, %v485_v27  ;;  %v388_v34 = vadd.f32 %v782_v28, %v1066_v46  ;;  %v444_v35 = vadd.f32 %v824_v29, %v1066_v46 }
 0x10c   :  { %v784_v36 = vpop.f32.mrf.mxu0  ;;  %v826_v37 = vpop.f32.mrf.mxu1 }
 0x10d   :  { %612 = vst.msk [vmem:[%s1211_s3 + $0x20] sm:$0xf] %vm603_vm0, %v717_v32  ;;  %626 = vst.msk [vmem:[%s1211_s3 + $0x58] sm:$0xf] %vm603_vm0, %v731_v33  ;;  %v472_v38 = vmax.f32 %v388_v34, 0.0  ;;  %v486_v39 = vmax.f32 %v444_v35, 0.0  ;;  %v785_v40 = vadd.f32 %v784_v36, %v783_v30  ;;  %v827_v41 = vadd.f32 %v826_v37, %v825_v31 }
 0x10e   :  { %v786_v42 = vpop.f32.mrf.mxu0  ;;  %v828_v43 = vpop.f32.mrf.mxu1 }
 0x10f   :  { %v718_v44 = vpack.c.bf16 %v472_v38, %v472_v38  ;;  %v732_v45 = vpack.c.bf16 %v486_v39, %v486_v39  ;;  %v393_v47 = vadd.f32 %v785_v40, %v1066_v46  ;;  %v449_v48 = vadd.f32 %v827_v41, %v1066_v46 }
 0x110   :  { %v787_v49 = vpop.f32.mrf.mxu0  ;;  %v829_v50 = vpop.f32.mrf.mxu1 }
 0x111   :  { %613 = vst.msk [vmem:[%s1211_s3 + $0x24] sm:$0xf] %vm603_vm0, %v718_v44  ;;  %627 = vst.msk [vmem:[%s1211_s3 + $0x5c] sm:$0xf] %vm603_vm0, %v732_v45  ;;  %v473_v51 = vmax.f32 %v393_v47, 0.0  ;;  %v487_v52 = vmax.f32 %v449_v48, 0.0  ;;  %v788_v53 = vadd.f32 %v787_v49, %v786_v42  ;;  %v830_v54 = vadd.f32 %v829_v50, %v828_v43 }
 0x112   :  { %v789_v55 = vpop.f32.mrf.mxu0  ;;  %v831_v56 = vpop.f32.mrf.mxu1 }
 0x113   :  { %v719_v57 = vpack.c.bf16 %v473_v51, %v473_v51  ;;  %v733_v58 = vpack.c.bf16 %v487_v52, %v487_v52  ;;  %v396_v59 = vadd.f32 %v788_v53, %v1066_v46  ;;  %v452_v60 = vadd.f32 %v830_v54, %v1066_v46 }
 0x114   :  { %v790_v61 = vpop.f32.mrf.mxu0  ;;  %v832_v62 = vpop.f32.mrf.mxu1 }
 0x115   :  { %614 = vst.msk [vmem:[%s1211_s3 + $0x28] sm:$0xf] %vm603_vm0, %v719_v57  ;;  %628 = vst.msk [vmem:[%s1211_s3 + $0x60] sm:$0xf] %vm603_vm0, %v733_v58  ;;  %v474_v63 = vmax.f32 %v396_v59, 0.0  ;;  %v488_v0 = vmax.f32 %v452_v60, 0.0  ;;  %v791_v1 = vadd.f32 %v790_v61, %v789_v55  ;;  %v833_v2 = vadd.f32 %v832_v62, %v831_v56 }
 0x116   :  { %v792_v3 = vpop.f32.mrf.mxu0  ;;  %v834_v4 = vpop.f32.mrf.mxu1 }
 0x117   :  { %v720_v5 = vpack.c.bf16 %v474_v63, %v474_v63  ;;  %v734_v6 = vpack.c.bf16 %v488_v0, %v488_v0  ;;  %v401_v7 = vadd.f32 %v791_v1, %v1066_v46  ;;  %v457_v8 = vadd.f32 %v833_v2, %v1066_v46 }
 0x118   :  { %v793_v9 = vpop.f32.mrf.mxu0  ;;  %v835_v10 = vpop.f32.mrf.mxu1 }
 0x119   :  { %615 = vst.msk [vmem:[%s1211_s3 + $0x2c] sm:$0xf] %vm603_vm0, %v720_v5  ;;  %629 = vst.msk [vmem:[%s1211_s3 + $0x64] sm:$0xf] %vm603_vm0, %v734_v6  ;;  %v475_v11 = vmax.f32 %v401_v7, 0.0  ;;  %v489_v12 = vmax.f32 %v457_v8, 0.0  ;;  %v794_v13 = vadd.f32 %v793_v9, %v792_v3  ;;  %v836_v14 = vadd.f32 %v835_v10, %v834_v4 }
 0x11b   :  { %v721_v15 = vpack.c.bf16 %v475_v11, %v475_v11  ;;  %v735_v16 = vpack.c.bf16 %v489_v12, %v489_v12  ;;  %v404_v17 = vadd.f32 %v794_v13, %v1066_v46  ;;  %v460_v18 = vadd.f32 %v836_v14, %v1066_v46 }
 0x11d   :  { %616 = vst.msk [vmem:[%s1211_s3 + $0x30] sm:$0xf] %vm603_vm0, %v721_v15  ;;  %630 = vst.msk [vmem:[%s1211_s3 + $0x68] sm:$0xf] %vm603_vm0, %v735_v16  ;;  %v476_v19 = vmax.f32 %v404_v17, 0.0  ;;  %v490_v20 = vmax.f32 %v460_v18, 0.0 }
 0x11f   :  { %v722_v21 = vpack.c.bf16 %v476_v19, %v476_v19  ;;  %v736_v22 = vpack.c.bf16 %v490_v20, %v490_v20 }
 0x121   :  { %617 = vst.msk [vmem:[%s1211_s3 + $0x34] sm:$0xf] %vm603_vm0, %v722_v21  ;;  %631 = vst.msk [vmem:[%s1211_s3 + $0x6c] sm:$0xf] %vm603_vm0, %v736_v22 }

// kernel: encoder_forward.7
= control target key start
LH: loop header
LB: loop body
LE: loop exit
PB: predicated region body
PF: predicated region fallthrough
CT: control target
= control target key end

     0   :  { %vm428_vm0 = vcmask 523264   ;;  %s737_s1 = inlined_call_operand.vmem [shape: bf16[512,64], index: 1, kind: input, shape index: {}]   ;;  %s738_s0 = inlined_call_operand.vmem [shape: bf16[32,512], index: 0, kind: input, shape index: {}]   ;;  %s739_s2 = inlined_call_operand.vmem [shape: f32[1,64], index: 2, kind: input, shape index: {}]   ;;  %s740_s3 = inlined_call_operand.vmem [shape: f32[32,64], index: 3, kind: output, shape index: {}]  }
   0x1   :  { %v534_v0 = vld [vmem:[%s737_s1 + $0x78] sm:$0xff]   ;;  %v538_v4 = vld [vmem:[%s737_s1 + $0x70] sm:$0xff]   ;;  %v542_v8 = vld [vmem:[%s737_s1 + $0x68] sm:$0xff]  }
   0x2   :  { %v535_v1 = vld [vmem:[%s737_s1 + $0xf8] sm:$0xff]   ;;  %478 = vmatprep.subr.bf16.mxu0 %v534_v0  ;;  %v539_v5 = vld [vmem:[%s737_s1 + $0xf0] sm:$0xff]   ;;  %v543_v9 = vld [vmem:[%s737_s1 + $0xe8] sm:$0xff]  }
   0x3   :  { %v536_v2 = vld [vmem:[%s737_s1 + $0x38] sm:$0xff]   ;;  %506 = vmatprep.subr.bf16.mxu1 %v535_v1  ;;  %v540_v6 = vld [vmem:[%s737_s1 + $0x30] sm:$0xff]   ;;  %v544_v10 = vld [vmem:[%s737_s1 + $0x28] sm:$0xff]  }
   0x4   :  { %v537_v3 = vld [vmem:[%s737_s1 + $0xb8] sm:$0xff]   ;;  %479 = vmatpush3.bf16.msra.mxu0 %v536_v2  ;;  %v541_v7 = vld [vmem:[%s737_s1 + $0xb0] sm:$0xff]   ;;  %v545_v11 = vld [vmem:[%s737_s1 + $0xa8] sm:$0xff]  }
   0x5   :  { %507 = vmatpush3.bf16.msra.mxu1 %v537_v3  ;;  %480 = vmatprep.subr.bf16.mxu0 %v538_v4  ;;  %v546_v12 = vld [vmem:[%s737_s1 + $0x60] sm:$0xff]   ;;  %v550_v16 = vld [vmem:[%s737_s1 + $0x58] sm:$0xff]   ;;  %v554_v20 = vld [vmem:[%s737_s1 + $0x50] sm:$0xff]  }
   0x6   :  { %508 = vmatprep.subr.bf16.mxu1 %v539_v5  ;;  %v547_v13 = vld [vmem:[%s737_s1 + $0xe0] sm:$0xff]   ;;  %v551_v17 = vld [vmem:[%s737_s1 + $0xd8] sm:$0xff]   ;;  %v555_v21 = vld [vmem:[%s737_s1 + $0xd0] sm:$0xff]  }
   0x7   :  { %v548_v14 = vld [vmem:[%s737_s1 + $0x20] sm:$0xff]   ;;  %v552_v18 = vld [vmem:[%s737_s1 + $0x18] sm:$0xff]   ;;  %v556_v22 = vld [vmem:[%s737_s1 + $0x10] sm:$0xff]  }
   0x8   :  { %481 = vmatpush3.bf16.msra.mxu0 %v540_v6  ;;  %v549_v15 = vld [vmem:[%s737_s1 + $0xa0] sm:$0xff]   ;;  %v553_v19 = vld [vmem:[%s737_s1 + $0x98] sm:$0xff]   ;;  %v557_v23 = vld [vmem:[%s737_s1 + $0x90] sm:$0xff]  }
   0x9   :  { %509 = vmatpush3.bf16.msra.mxu1 %v541_v7  ;;  %482 = vmatprep.subr.bf16.mxu0 %v542_v8  ;;  %v558_v24 = vld [vmem:[%s737_s1 + $0x48] sm:$0xff]   ;;  %v562_v28 = vld [vmem:[%s737_s1 + $0x40] sm:$0xff]  }
   0xa   :  { %510 = vmatprep.subr.bf16.mxu1 %v543_v9  ;;  %v559_v25 = vld [vmem:[%s737_s1 + $0xc8] sm:$0xff]   ;;  %v563_v29 = vld [vmem:[%s737_s1 + $0xc0] sm:$0xff]  }
   0xb   :  { %v560_v26 = vld [vmem:[%s737_s1 + $0x8] sm:$0xff]   ;;  %v564_v30 = vld [vmem:[%s737_s1] sm:$0xff]  }
   0xc   :  { %483 = vmatpush3.bf16.msra.mxu0 %v544_v10  ;;  %v561_v27 = vld [vmem:[%s737_s1 + $0x88] sm:$0xff]   ;;  %v565_v31 = vld [vmem:[%s737_s1 + $0x80] sm:$0xff]  }
   0xd   :  { %511 = vmatpush3.bf16.msra.mxu1 %v545_v11  ;;  %484 = vmatprep.subr.bf16.mxu0 %v546_v12  ;;  %v566_v32 = vld [vmem:[%s738_s0] ss:$16 sps:$4 sm:$0xff]   ;;  %v568_v33 = vld [vmem:[%s738_s0 + $0x4] ss:$16 sps:$4 sm:$0xff]   ;;  %v569_v34 = vld [vmem:[%s738_s0 + $0x8] ss:$16 sps:$4 sm:$0xff]  }
   0xe   :  { %512 = vmatprep.subr.bf16.mxu1 %v547_v13  ;;  %v571_v35 = vld [vmem:[%s738_s0 + $0xc] ss:$16 sps:$4 sm:$0xff]   ;;  %358 = vmatprep.mubr.bf16.mxu0 %v568_v33  ;;  %v572_v36 = vld [vmem:[%s738_s0 + $0x24] ss:$16 sps:$4 sm:$0xff]   ;;  %v576_v38 = vld [vmem:[%s738_s0 + $0x20] ss:$16 sps:$4 sm:$0xff]  }
   0xf   :  { %407 = vmatprep.mubr.bf16.mxu1 %v571_v35  ;;  %v574_v37 = vld [vmem:[%s738_s0 + $0x2c] ss:$16 sps:$4 sm:$0xff]   ;;  %v577_v39 = vld [vmem:[%s738_s0 + $0x28] ss:$16 sps:$4 sm:$0xff]   ;;  %v437_v42 = vld [vmem:[%s739_s2] ss:$0 sm:$0xff] }
  0x10   :  { %485 = vmatpush3.bf16.msra.mxu0 %v548_v14 }
  0x11   :  { %513 = vmatpush3.bf16.msra.mxu1 %v549_v15  ;;  %486 = vmatprep.subr.bf16.mxu0 %v550_v16 }
  0x12   :  { %514 = vmatprep.subr.bf16.mxu1 %v551_v17 }
  0x14   :  { %487 = vmatpush3.bf16.msra.mxu0 %v552_v18 }
  0x15   :  { %515 = vmatpush3.bf16.msra.mxu1 %v553_v19  ;;  %488 = vmatprep.subr.bf16.mxu0 %v554_v20 }
  0x16   :  { %516 = vmatprep.subr.bf16.mxu1 %v555_v21 }
  0x18   :  { %489 = vmatpush3.bf16.msra.mxu0 %v556_v22 }
  0x19   :  { %517 = vmatpush3.bf16.msra.mxu1 %v557_v23  ;;  %490 = vmatprep.subr.bf16.mxu0 %v558_v24 }
  0x1a   :  { %518 = vmatprep.subr.bf16.mxu1 %v559_v25 }
  0x1c   :  { %491 = vmatpush3.bf16.msra.mxu0 %v560_v26 }
  0x1d   :  { %519 = vmatpush3.bf16.msra.mxu1 %v561_v27  ;;  %492 = vmatprep.subr.bf16.mxu0 %v562_v28 }
  0x1e   :  { %520 = vmatprep.subr.bf16.mxu1 %v563_v29 }
  0x20   :  { %493 = vmatpush3.bf16.msra.mxu0 %v564_v30 }
  0x21   :  { %521 = vmatpush3.bf16.msra.mxu1 %v565_v31 }
  0x23   :  { %359 = vmatmul.mubr.bf16.vlgmr.msra.gmra.mxu0 %v566_v32 }
  0x24   :  { %408 = vmatmul.mubr.bf16.vlgmr.msra.gmra.mxu1 %v569_v34  ;;  %366 = vmatprep.mubr.bf16.mxu0 %v572_v36 }
  0x25   :  { %415 = vmatprep.mubr.bf16.mxu1 %v574_v37 }
  0x2b   :  { %367 = vmatmul.mubr.bf16.gmra.mxu0 %v576_v38 }
  0x2c   :  { %416 = vmatmul.mubr.bf16.gmra.mxu1 %v577_v39 }
  0xe3   :  { %v494_v40 = vpop.f32.mrf.mxu0 }
  0xe4   :  { %v522_v41 = vpop.f32.mrf.mxu1 }
  0xe5   :  { %v495_v43 = vpop.f32.mrf.mxu0 }
  0xe6   :  { %v496_v44 = vadd.f32 %v495_v43, %v494_v40  ;;  %v523_v45 = vpop.f32.mrf.mxu1 }
  0xe7   :  { %v497_v46 = vpop.f32.mrf.mxu0  ;;  %v524_v48 = vadd.f32 %v523_v45, %v522_v41 }
  0xe8   :  { %v361_v47 = vadd.f32 %v496_v44, %v437_v42  ;;  %v525_v49 = vpop.f32.mrf.mxu1 }
  0xe9   :  { %v498_v50 = vpop.f32.mrf.mxu0 }
  0xea   :  { %v410_v51 = vadd.f32 %v524_v48, %v361_v47  ;;  %v499_v52 = vadd.f32 %v498_v50, %v497_v46  ;;  %v526_v53 = vpop.f32.mrf.mxu1 }
  0xeb   :  { %v500_v54 = vpop.f32.mrf.mxu0  ;;  %v527_v57 = vadd.f32 %v526_v53, %v525_v49 }
  0xec   :  { %v424_v55 = vmax.f32 %v410_v51, 0.0  ;;  %v364_v56 = vadd.f32 %v499_v52, %v437_v42  ;;  %v528_v58 = vpop.f32.mrf.mxu1 }
  0xed   :  { %v501_v59 = vpop.f32.mrf.mxu0 }
  0xee   :  { %429 = vst.msk [vmem:[%s740_s3] sm:$0xff] %vm428_vm0, %v424_v55  ;;  %v413_v60 = vadd.f32 %v527_v57, %v364_v56  ;;  %v502_v61 = vadd.f32 %v501_v59, %v500_v54  ;;  %v529_v62 = vpop.f32.mrf.mxu1 }
  0xef   :  { %v503_v63 = vpop.f32.mrf.mxu0  ;;  %v530_v2 = vadd.f32 %v529_v62, %v528_v58 }
  0xf0   :  { %v425_v0 = vmax.f32 %v413_v60, 0.0  ;;  %v369_v1 = vadd.f32 %v502_v61, %v437_v42  ;;  %v531_v3 = vpop.f32.mrf.mxu1 }
  0xf1   :  { %v504_v4 = vpop.f32.mrf.mxu0 }
  0xf2   :  { %430 = vst.msk [vmem:[%s740_s3 + $0x8] sm:$0xff] %vm428_vm0, %v425_v0  ;;  %v418_v5 = vadd.f32 %v530_v2, %v369_v1  ;;  %v505_v6 = vadd.f32 %v504_v4, %v503_v63  ;;  %v532_v7 = vpop.f32.mrf.mxu1 }
  0xf3   :  { %v533_v10 = vadd.f32 %v532_v7, %v531_v3 }
  0xf4   :  { %v426_v8 = vmax.f32 %v418_v5, 0.0  ;;  %v372_v9 = vadd.f32 %v505_v6, %v437_v42 }
  0xf6   :  { %431 = vst.msk [vmem:[%s740_s3 + $0x10] sm:$0xff] %vm428_vm0, %v426_v8  ;;  %v421_v11 = vadd.f32 %v533_v10, %v372_v9 }
  0xf8   :  { %v427_v12 = vmax.f32 %v421_v11, 0.0 }
  0xfa   :  { %432 = vst.msk [vmem:[%s740_s3 + $0x18] sm:$0xff] %vm428_vm0, %v427_v12 }

</bundles_post_ra>
